<compile_context>
chip_gen: v7x
topology: tpu7x:2x2x1
jax: 0.10.0
libtpu: 0.0.40
codegen_flags: <defaults>
</compile_context>

<pallas_src>
import functools

import jax
import jax.numpy as jnp
from jax import lax
from jax.experimental import pallas as pl
from jax.experimental.pallas import tpu as pltpu

EMBED = 256
HIDDEN = 128
FC1 = 64
FC1_PAD = 128          # lane-dense padding of the FC hidden dim (extra cols/rows are inert)
NCLASS = 2
BN_EPS = 1e-5

# Per-row VMEM cost of the pipeline state:
#   x chunk  (bf16, double-buffered by BlockSpec) : 2 * EMBED * 2 bytes
#   gates    (f32,  double-buffered scratch)      : 2 * 4*HIDDEN * 4 bytes
_ROW_BYTES = 2 * EMBED * 2 + 2 * 4 * HIDDEN * 4      # 5120 B / row
_ROW_BUDGET_BYTES = 10 * 1024 * 1024                 # keeps total (+weights/intermediates) << limit
_MAX_T_CHUNK = 32                                    # unroll / code-size cap
_VMEM_LIMIT_BYTES = 32 * 1024 * 1024                 # ok on v5e/v6e (128 MiB phys) and v7x (64 MiB phys)


def _round_up(x, m):
    return (x + m - 1) // m * m


def _pick_t_chunk(seq_len, b_block):
    max_rows = max(8, _ROW_BUDGET_BYTES // _ROW_BYTES)
    return max(1, min(_MAX_T_CHUNK, max_rows // b_block, seq_len))


# --------------------- pipelined LSTM recurrence kernel ----------------------
def lstm_recurrence_kernel(x_ref, wih_ref, whh_ref, b_ref, hT_ref,
                           gates_scr, h_scr, c_scr, *,
                           t_chunk, b_block, n_chunks, seq_len, mask_tail):
    """Grid = (batch_blocks, n_chunks + 1); the time axis is sequential.

    Software pipeline (per batch block):
      step t < n_chunks : project x chunk t            -> gates_scr[t & 1]   (MXU)
      step t > 0        : recurrence of chunk t-1 from    gates_scr[(t-1)&1] (EUP/serial)
    The stages use disjoint gates slots (no data dependency), and a trailing
    step t == n_chunks drains the last chunk and emits h_T for the block.

    x_ref   : (t_chunk*b_block, EMBED) bf16 rows, row = s*b_block + j (time-major in chunk)
    wih_ref : (EMBED, 4H) bf16,  whh_ref : (H, 4H) bf16, gate order (i, f, o, g)
    b_ref   : (1, 4H) f32  (= b_ih + b_hh)
    hT_ref  : (b_block, H) f32, written on the trailing step only
    """
    t = pl.program_id(1)
    H = HIDDEN

    @pl.when(t == 0)
    def _init():
        h_scr[...] = jnp.zeros_like(h_scr)
        c_scr[...] = jnp.zeros_like(c_scr)

    @pl.when(t < n_chunks)
    def _project():
        slot = t & 1
        gates_scr[slot] = (
            jnp.dot(x_ref[...], wih_ref[...], preferred_element_type=jnp.float32)
            + b_ref[...])                                    # (rows, 4H) f32

    @pl.when(t > 0)
    def _recurrence():
        chunk = t - 1
        slot = chunk & 1
        whh = whh_ref[...]                                   # (H, 4H) bf16
        h = h_scr[...]                                       # (b_block, H) f32
        c = c_scr[...]
        # Fully unrolled chunk recurrence; h/c live in vregs across the chunk.
        for s in range(t_chunk):
            g = gates_scr[slot, s * b_block:(s + 1) * b_block, :] + jnp.dot(
                h.astype(jnp.bfloat16), whh, preferred_element_type=jnp.float32)
            # Gate layout (i, f, o, g): one contiguous sigmoid + one tanh.
            sig = jax.nn.sigmoid(g[:, :3 * H])
            i_g = sig[:, 0 * H:1 * H]
            f_g = sig[:, 1 * H:2 * H]
            o_g = sig[:, 2 * H:3 * H]
            g_g = jnp.tanh(g[:, 3 * H:4 * H])
            c_new = f_g * c + i_g * g_g
            h_new = o_g * jnp.tanh(c_new)
            if mask_tail:
                # Freeze h/c on timesteps that only exist because T was padded
                # up to a multiple of t_chunk.
                valid = (chunk * t_chunk + s) < seq_len
                c = jnp.where(valid, c_new, c)
                h = jnp.where(valid, h_new, h)
            else:
                c, h = c_new, h_new
        h_scr[...] = h
        c_scr[...] = c

    @pl.when(t == n_chunks)
    def _emit():
        hT_ref[...] = h_scr[...]


def run_lstm_recurrence(x_flat, params, *, b_block, n_bblocks, t_chunk,
                        n_chunks, seq_len):
    rows = t_chunk * b_block
    n_steps = n_chunks + 1                       # +1 trailing step drains the pipeline
    H = HIDDEN
    mask_tail = (n_chunks * t_chunk != seq_len)
    const = lambda bb, t: (0, 0)
    kernel = functools.partial(
        lstm_recurrence_kernel, t_chunk=t_chunk, b_block=b_block,
        n_chunks=n_chunks, seq_len=seq_len, mask_tail=mask_tail)
    return pl.pallas_call(
        kernel,
        out_shape=jax.ShapeDtypeStruct((n_bblocks * b_block, H), jnp.float32),
        grid_spec=pltpu.PrefetchScalarGridSpec(
            num_scalar_prefetch=0,
            grid=(n_bblocks, n_steps),
            in_specs=[
                # x chunk t for batch block bb; the trailing step's fetch is
                # clamped (unused by the body).
                pl.BlockSpec((rows, EMBED),
                             lambda bb, t: (bb * n_chunks
                                            + jnp.minimum(t, n_chunks - 1), 0)),
                pl.BlockSpec((EMBED, 4 * H), const),         # W_ih (bf16)
                pl.BlockSpec((H, 4 * H), const),             # W_hh (bf16)
                pl.BlockSpec((1, 4 * H), const),             # bias (f32)
            ],
            out_specs=pl.BlockSpec((b_block, H), lambda bb, t: (bb, 0)),
            scratch_shapes=[
                pltpu.VMEM((2, rows, 4 * H), jnp.float32),   # double-buffered gates
                pltpu.VMEM((b_block, H), jnp.float32),       # h state
                pltpu.VMEM((b_block, H), jnp.float32),       # c state
            ],
        ),
        compiler_params=pltpu.CompilerParams(
            # batch blocks shard across v7x's 2 TensorCores; time is sequential
            dimension_semantics=("parallel", "arbitrary"),
            vmem_limit_bytes=_VMEM_LIMIT_BYTES),
    )(x_flat, params["w_ih"], params["w_hh"], params["b_lstm"])


# ------------------------------- FC head kernel -------------------------------
def fc_head_kernel(h_ref, w1_ref, b1_ref, gamma_ref, beta_ref, w2_ref, b2_ref,
                   out_ref):
    z = jnp.dot(h_ref[...], w1_ref[...], preferred_element_type=jnp.float32) + b1_ref[...]
    z = jnp.maximum(z, 0.0)
    # BatchNorm1d in training mode: biased batch statistics, eps = 1e-5.
    mean = jnp.mean(z, axis=0, keepdims=True)
    var = jnp.mean((z - mean) ** 2, axis=0, keepdims=True)
    z = (z - mean) * lax.rsqrt(var + BN_EPS)
    z = z * gamma_ref[...] + beta_ref[...]
    z = jnp.dot(z, w2_ref[...], preferred_element_type=jnp.float32) + b2_ref[...]
    out_ref[...] = jax.nn.sigmoid(z)


def run_fc_head(h_last, params):
    b = h_last.shape[0]
    const = lambda i: (0, 0)
    return pl.pallas_call(
        fc_head_kernel,
        out_shape=jax.ShapeDtypeStruct((b, NCLASS), jnp.float32),
        grid_spec=pltpu.PrefetchScalarGridSpec(
            num_scalar_prefetch=0,
            grid=(1,),
            in_specs=[
                pl.BlockSpec((b, HIDDEN), const),
                pl.BlockSpec((HIDDEN, FC1_PAD), const),
                pl.BlockSpec((1, FC1_PAD), const),
                pl.BlockSpec((1, FC1_PAD), const),
                pl.BlockSpec((1, FC1_PAD), const),
                pl.BlockSpec((FC1_PAD, NCLASS), const),
                pl.BlockSpec((1, NCLASS), const),
            ],
            out_specs=pl.BlockSpec((b, NCLASS), const),
        ),
    )(h_last, params["w1"], params["b1"], params["gamma"], params["beta"],
      params["w2"], params["b2"])


# --------------------------------- forward ------------------------------------
@jax.jit
def lstm_model_forward(x_ids, x_lens, params):
    # x_lens is accepted but unused: the PyTorch reference calls self.lstm(x)
    # without packing, so padded timesteps are folded in exactly the same way.
    del x_lens
    B, T = x_ids.shape
    assert T >= 1

    b_pad = _round_up(B, 8)                                   # opt 6: aligned rows
    n_bblocks = 2 if (b_pad >= 16 and b_pad % 16 == 0) else 1  # opt 2: v7x 2-TC batch split
    b_block = b_pad // n_bblocks
    t_chunk = _pick_t_chunk(T, b_block)                       # opt 4: VMEM-aware chunking
    t_pad = _round_up(T, t_chunk)                             # opt 7: remainder via pad+mask
    n_chunks = t_pad // t_chunk

    ids = jnp.pad(x_ids, ((0, b_pad - B), (0, t_pad - T)))    # pad with token id 0
    # Gather the bf16 embedding directly in (batch_block, time, batch) order so
    # each (batch_block, time_chunk) grid cell is one contiguous row block —
    # no f32 gather, no cast pass, no HBM transpose (opt 3).
    ids = ids.reshape(n_bblocks, b_block, t_pad).transpose(0, 2, 1).reshape(-1)
    emb = jnp.take(params["embedding"], ids, axis=0)          # (nb*t_pad*b_block, E) bf16

    h_t = run_lstm_recurrence(emb, params, b_block=b_block, n_bblocks=n_bblocks,
                              t_chunk=t_chunk, n_chunks=n_chunks, seq_len=T)
    # Drop batch-padding rows BEFORE the head so BatchNorm statistics are exact.
    return run_fc_head(h_t[:B], params)


def init_params(key, vocab_size):
    ks = jax.random.split(key, 8)
    H, E = HIDDEN, EMBED
    u = lambda k, shape, s: jax.random.uniform(k, shape, jnp.float32, -s, s)
    s_l = 1.0 / (H ** 0.5)
    s_2 = 1.0 / (FC1 ** 0.5)
    pad = FC1_PAD - FC1
    w1 = jnp.pad(u(ks[4], (H, FC1), s_l), ((0, 0), (0, pad)))
    b1 = jnp.pad(u(ks[5], (1, FC1), s_l), ((0, 0), (0, pad)))
    gamma = jnp.pad(jnp.ones((1, FC1), jnp.float32), ((0, 0), (0, pad)))
    beta = jnp.zeros((1, FC1_PAD), jnp.float32)
    w2 = jnp.pad(u(ks[6], (FC1, NCLASS), s_2), ((0, pad), (0, 0)))  # zero rows => padding inert
    return {
        # frozen "pretrained" embedding (`weigh` placeholder), stored bf16 so
        # the pre-kernel gather is a single low-traffic HBM pass (opt 3).
        "embedding": jax.random.normal(ks[0], (vocab_size, E), jnp.float32).astype(jnp.bfloat16),
        # LSTM params stored transposed (x @ w_ih, h @ w_hh) with gate columns
        # laid out (i, f, o, g) (opt 5).  Real PyTorch weights (order i,f,g,o)
        # would be permuted/transposed offline to this layout.
        # bf16 matmul operands; f32 bias and accumulation.
        "w_ih": u(ks[1], (E, 4 * H), s_l).astype(jnp.bfloat16),
        "w_hh": u(ks[2], (H, 4 * H), s_l).astype(jnp.bfloat16),
        "b_lstm": u(ks[3], (1, 4 * H), s_l),                  # b_ih + b_hh, f32, (i,f,o,g)
        "w1": w1, "b1": b1, "gamma": gamma, "beta": beta,
        "w2": w2, "b2": u(ks[7], (1, NCLASS), s_2),
    }
    # TODO(synk): nn.LSTM dropout=0.37 is a no-op for num_layers=1 (PyTorch only
    # applies dropout between stacked layers), so it is intentionally omitted.
    # TODO(synk): BatchNorm1d running_mean/var are not tracked; the head always
    # uses batch statistics (training-mode forward), matching the module as built.


if __name__ == "__main__":
    B, T, VOCAB = 2, 8, 32
    key = jax.random.PRNGKey(0)
    kp, kx = jax.random.split(key, 2)
    params = init_params(kp, VOCAB)
    x_ids = jax.random.randint(kx, (B, T), 0, VOCAB, dtype=jnp.int32)
    x_lens = jnp.full((B,), T, dtype=jnp.int32)

    out = lstm_model_forward(x_ids, x_lens, params)
    jax.block_until_ready(out)
    assert out.shape == (B, NCLASS) and out.dtype == jnp.float32
    assert bool(jnp.all(jnp.isfinite(out)))
    print("KERNEL_OK")
</pallas_src>

<mosaic_0001>
module attributes {stable_mosaic.version = 11 : i64} {
  func.func @fc_head_kernel(%arg0: i32, %arg1: memref<2x128xf32, #tpu.memory_space<vmem>>, %arg2: memref<128x128xf32, #tpu.memory_space<vmem>>, %arg3: memref<1x128xf32, #tpu.memory_space<vmem>>, %arg4: memref<1x128xf32, #tpu.memory_space<vmem>>, %arg5: memref<1x128xf32, #tpu.memory_space<vmem>>, %arg6: memref<128x2xf32, #tpu.memory_space<vmem>>, %arg7: memref<1x2xf32, #tpu.memory_space<vmem>>, %arg8: memref<2x2xf32, #tpu.memory_space<vmem>>) attributes {dimension_semantics = [#tpu.dimension_semantics<arbitrary>], iteration_bounds = array<i64: 1>, scalar_prefetch = 0 : i64, scratch_operands = 0 : i64, tpu.core_type = #tpu.core_type<tc>, window_params = [{pipeline_mode = #tpu.pipeline_mode<synchronous>, transform_indices = @transform_0, window_bounds = array<i64: 2, 128>}, {pipeline_mode = #tpu.pipeline_mode<synchronous>, transform_indices = @transform_1, window_bounds = array<i64: 128, 128>}, {pipeline_mode = #tpu.pipeline_mode<synchronous>, transform_indices = @transform_2, window_bounds = array<i64: 1, 128>}, {pipeline_mode = #tpu.pipeline_mode<synchronous>, transform_indices = @transform_3, window_bounds = array<i64: 1, 128>}, {pipeline_mode = #tpu.pipeline_mode<synchronous>, transform_indices = @transform_4, window_bounds = array<i64: 1, 128>}, {pipeline_mode = #tpu.pipeline_mode<synchronous>, transform_indices = @transform_5, window_bounds = array<i64: 128, 2>}, {pipeline_mode = #tpu.pipeline_mode<synchronous>, transform_indices = @transform_6, window_bounds = array<i64: 1, 2>}, {pipeline_mode = #tpu.pipeline_mode<synchronous>, transform_indices = @transform_7, window_bounds = array<i64: 2, 2>}]} {
    %c0 = arith.constant 0 : index
    %c0_0 = arith.constant 0 : index
    %0 = vector.load %arg1[%c0, %c0_0] : memref<2x128xf32, #tpu.memory_space<vmem>>, vector<2x128xf32>
    %c0_1 = arith.constant 0 : index
    %c0_2 = arith.constant 0 : index
    %1 = vector.load %arg2[%c0_1, %c0_2] : memref<128x128xf32, #tpu.memory_space<vmem>>, vector<128x128xf32>
    %cst = arith.constant dense<0.000000e+00> : vector<2x128xf32>
    %2 = tpu.matmul %0, %1, %cst {dimension_numbers = #tpu.dot_dimension_numbers<[1], [0], [0], [1], [0, 0, 1, 1], [], []>} : vector<2x128xf32>, vector<128x128xf32>, vector<2x128xf32> -> vector<2x128xf32>
    %c0_3 = arith.constant 0 : index
    %c0_4 = arith.constant 0 : index
    %3 = vector.load %arg3[%c0_3, %c0_4] : memref<1x128xf32, #tpu.memory_space<vmem>>, vector<1x128xf32>
    %4 = vector.broadcast %3 : vector<1x128xf32> to vector<2x128xf32>
    %5 = arith.addf %2, %4 : vector<2x128xf32>
    %cst_5 = arith.constant 0.000000e+00 : f32
    %6 = vector.broadcast %cst_5 : f32 to vector<2x128xf32>
    %7 = arith.maximumf %5, %6 : vector<2x128xf32>
    %cst_6 = arith.constant dense<0.000000e+00> : vector<128xf32>
    %8 = vector.multi_reduction <add>, %7, %cst_6 [0] : vector<2x128xf32> to vector<128xf32>
    %9 = vector.shape_cast %8 : vector<128xf32> to vector<1x128xf32>
    %cst_7 = arith.constant 2.000000e+00 : f32
    %10 = vector.broadcast %cst_7 : f32 to vector<1x128xf32>
    %11 = arith.divf %9, %10 : vector<1x128xf32>
    %12 = vector.broadcast %11 : vector<1x128xf32> to vector<2x128xf32>
    %13 = arith.subf %7, %12 : vector<2x128xf32>
    %14 = arith.mulf %13, %13 : vector<2x128xf32>
    %cst_8 = arith.constant dense<0.000000e+00> : vector<128xf32>
    %15 = vector.multi_reduction <add>, %14, %cst_8 [0] : vector<2x128xf32> to vector<128xf32>
    %16 = vector.shape_cast %15 : vector<128xf32> to vector<1x128xf32>
    %cst_9 = arith.constant 2.000000e+00 : f32
    %17 = vector.broadcast %cst_9 : f32 to vector<1x128xf32>
    %18 = arith.divf %16, %17 : vector<1x128xf32>
    %19 = vector.broadcast %11 : vector<1x128xf32> to vector<2x128xf32>
    %20 = arith.subf %7, %19 : vector<2x128xf32>
    %cst_10 = arith.constant 9.99999974E-6 : f32
    %21 = vector.broadcast %cst_10 : f32 to vector<1x128xf32>
    %22 = arith.addf %18, %21 : vector<1x128xf32>
    %23 = math.rsqrt %22 : vector<1x128xf32>
    %24 = vector.broadcast %23 : vector<1x128xf32> to vector<2x128xf32>
    %25 = arith.mulf %20, %24 : vector<2x128xf32>
    %c0_11 = arith.constant 0 : index
    %c0_12 = arith.constant 0 : index
    %26 = vector.load %arg4[%c0_11, %c0_12] : memref<1x128xf32, #tpu.memory_space<vmem>>, vector<1x128xf32>
    %27 = vector.broadcast %26 : vector<1x128xf32> to vector<2x128xf32>
    %28 = arith.mulf %25, %27 : vector<2x128xf32>
    %c0_13 = arith.constant 0 : index
    %c0_14 = arith.constant 0 : index
    %29 = vector.load %arg5[%c0_13, %c0_14] : memref<1x128xf32, #tpu.memory_space<vmem>>, vector<1x128xf32>
    %30 = vector.broadcast %29 : vector<1x128xf32> to vector<2x128xf32>
    %31 = arith.addf %28, %30 : vector<2x128xf32>
    %c0_15 = arith.constant 0 : index
    %c0_16 = arith.constant 0 : index
    %32 = vector.load %arg6[%c0_15, %c0_16] : memref<128x2xf32, #tpu.memory_space<vmem>>, vector<128x2xf32>
    %cst_17 = arith.constant dense<0.000000e+00> : vector<2x2xf32>
    %33 = tpu.matmul %31, %32, %cst_17 {dimension_numbers = #tpu.dot_dimension_numbers<[1], [0], [0], [1], [0, 0, 1, 1], [], []>} : vector<2x128xf32>, vector<128x2xf32>, vector<2x2xf32> -> vector<2x2xf32>
    %c0_18 = arith.constant 0 : index
    %c0_19 = arith.constant 0 : index
    %34 = vector.load %arg7[%c0_18, %c0_19] : memref<1x2xf32, #tpu.memory_space<vmem>>, vector<1x2xf32>
    %35 = vector.broadcast %34 : vector<1x2xf32> to vector<2x2xf32>
    %36 = arith.addf %33, %35 : vector<2x2xf32>
    %37 = arith.negf %36 : vector<2x2xf32>
    %38 = math.exp %37 : vector<2x2xf32>
    %cst_20 = arith.constant 1.000000e+00 : f32
    %39 = vector.broadcast %cst_20 : f32 to vector<2x2xf32>
    %40 = arith.addf %39, %38 : vector<2x2xf32>
    %41 = arith.divf %39, %40 : vector<2x2xf32>
    %c0_21 = arith.constant 0 : index
    %c0_22 = arith.constant 0 : index
    %42 = vector.load %arg8[%c0_21, %c0_22] : memref<2x2xf32, #tpu.memory_space<vmem>>, vector<2x2xf32>
    tpu.vector_store %arg8[%c0_21, %c0_22], %41 {strides = array<i32>} : memref<2x2xf32, #tpu.memory_space<vmem>>, vector<2x2xf32>,
    return
  }
  func.func @transform_0(%arg0: i32) -> (i32, i32) {
    %c0_i32 = arith.constant 0 : i32
    %c0_i32_0 = arith.constant 0 : i32
    %c0_i32_1 = arith.constant 0 : i32
    return %c0_i32, %c0_i32_0 : i32, i32
  }
  func.func @transform_1(%arg0: i32) -> (i32, i32) {
    %c0_i32 = arith.constant 0 : i32
    %c0_i32_0 = arith.constant 0 : i32
    %c0_i32_1 = arith.constant 0 : i32
    return %c0_i32, %c0_i32_0 : i32, i32
  }
  func.func @transform_2(%arg0: i32) -> (i32, i32) {
    %c0_i32 = arith.constant 0 : i32
    %c0_i32_0 = arith.constant 0 : i32
    %c0_i32_1 = arith.constant 0 : i32
    return %c0_i32, %c0_i32_0 : i32, i32
  }
  func.func @transform_3(%arg0: i32) -> (i32, i32) {
    %c0_i32 = arith.constant 0 : i32
    %c0_i32_0 = arith.constant 0 : i32
    %c0_i32_1 = arith.constant 0 : i32
    return %c0_i32, %c0_i32_0 : i32, i32
  }
  func.func @transform_4(%arg0: i32) -> (i32, i32) {
    %c0_i32 = arith.constant 0 : i32
    %c0_i32_0 = arith.constant 0 : i32
    %c0_i32_1 = arith.constant 0 : i32
    return %c0_i32, %c0_i32_0 : i32, i32
  }
  func.func @transform_5(%arg0: i32) -> (i32, i32) {
    %c0_i32 = arith.constant 0 : i32
    %c0_i32_0 = arith.constant 0 : i32
    %c0_i32_1 = arith.constant 0 : i32
    return %c0_i32, %c0_i32_0 : i32, i32
  }
  func.func @transform_6(%arg0: i32) -> (i32, i32) {
    %c0_i32 = arith.constant 0 : i32
    %c0_i32_0 = arith.constant 0 : i32
    %c0_i32_1 = arith.constant 0 : i32
    return %c0_i32, %c0_i32_0 : i32, i32
  }
  func.func @transform_7(%arg0: i32) -> (i32, i32) {
    %c0_i32 = arith.constant 0 : i32
    %c0_i32_0 = arith.constant 0 : i32
    %c0_i32_1 = arith.constant 0 : i32
    return %c0_i32, %c0_i32_0 : i32, i32
  }
}

module attributes {stable_mosaic.version = 11 : i64} {
  func.func @lstm_recurrence_kernel(%arg0: i32, %arg1: i32, %arg2: memref<64x256xbf16, #tpu.memory_space<vmem>>, %arg3: memref<256x512xbf16, #tpu.memory_space<vmem>>, %arg4: memref<128x512xbf16, #tpu.memory_space<vmem>>, %arg5: memref<1x512xf32, #tpu.memory_space<vmem>>, %arg6: memref<8x128xf32, #tpu.memory_space<vmem>>, %arg7: memref<2x64x512xf32, #tpu.memory_space<vmem>>, %arg8: memref<8x128xf32, #tpu.memory_space<vmem>>, %arg9: memref<8x128xf32, #tpu.memory_space<vmem>>) attributes {dimension_semantics = [#tpu.dimension_semantics<parallel>, #tpu.dimension_semantics<arbitrary>], iteration_bounds = array<i64: 1, 2>, scalar_prefetch = 0 : i64, scratch_operands = 3 : i64, tpu.core_type = #tpu.core_type<tc>, window_params = [{transform_indices = @transform_0, window_bounds = array<i64: 64, 256>}, {pipeline_mode = #tpu.pipeline_mode<synchronous>, transform_indices = @transform_1, window_bounds = array<i64: 256, 512>}, {pipeline_mode = #tpu.pipeline_mode<synchronous>, transform_indices = @transform_2, window_bounds = array<i64: 128, 512>}, {pipeline_mode = #tpu.pipeline_mode<synchronous>, transform_indices = @transform_3, window_bounds = array<i64: 1, 512>}, {transform_indices = @transform_4, window_bounds = array<i64: 8, 128>}]} {
    %c0_i32 = arith.constant 0 : i32
    %0 = arith.cmpi eq, %arg1, %c0_i32 : i32
    %1 = arith.extui %0 : i1 to i32
    %c0_i32_0 = arith.constant 0 : i32
    %2 = arith.cmpi ne, %1, %c0_i32_0 : i32
    scf.if %2 {
      %cst = arith.constant 0.000000e+00 : f32
      %12 = vector.broadcast %cst : f32 to vector<8x128xf32>
      %c0 = arith.constant 0 : index
      %c0_6 = arith.constant 0 : index
      %13 = vector.load %arg8[%c0, %c0_6] : memref<8x128xf32, #tpu.memory_space<vmem>>, vector<8x128xf32>
      tpu.vector_store %arg8[%c0, %c0_6], %12 {strides = array<i32>} : memref<8x128xf32, #tpu.memory_space<vmem>>, vector<8x128xf32>,
      %cst_7 = arith.constant 0.000000e+00 : f32
      %14 = vector.broadcast %cst_7 : f32 to vector<8x128xf32>
      %c0_8 = arith.constant 0 : index
      %c0_9 = arith.constant 0 : index
      %15 = vector.load %arg9[%c0_8, %c0_9] : memref<8x128xf32, #tpu.memory_space<vmem>>, vector<8x128xf32>
      tpu.vector_store %arg9[%c0_8, %c0_9], %14 {strides = array<i32>} : memref<8x128xf32, #tpu.memory_space<vmem>>, vector<8x128xf32>,
    } else {
    }
    %c1_i32 = arith.constant 1 : i32
    %3 = arith.cmpi slt, %arg1, %c1_i32 : i32
    %4 = arith.extui %3 : i1 to i32
    %c0_i32_1 = arith.constant 0 : i32
    %5 = arith.cmpi ne, %4, %c0_i32_1 : i32
    scf.if %5 {
      %c1_i32_6 = arith.constant 1 : i32
      %12 = arith.andi %arg1, %c1_i32_6 : i32
      %c0 = arith.constant 0 : index
      %c0_7 = arith.constant 0 : index
      %13 = vector.load %arg2[%c0, %c0_7] : memref<64x256xbf16, #tpu.memory_space<vmem>>, vector<64x256xbf16>
      %c0_8 = arith.constant 0 : index
      %c0_9 = arith.constant 0 : index
      %14 = vector.load %arg3[%c0_8, %c0_9] : memref<256x512xbf16, #tpu.memory_space<vmem>>, vector<256x512xbf16>
      %cst = arith.constant dense<0.000000e+00> : vector<64x512xf32>
      %15 = tpu.matmul %13, %14, %cst {dimension_numbers = #tpu.dot_dimension_numbers<[1], [0], [0], [1], [0, 0, 1, 1], [], []>} : vector<64x256xbf16>, vector<256x512xbf16>, vector<64x512xf32> -> vector<64x512xf32>
      %c0_10 = arith.constant 0 : index
      %c0_11 = arith.constant 0 : index
      %16 = vector.load %arg5[%c0_10, %c0_11] : memref<1x512xf32, #tpu.memory_space<vmem>>, vector<1x512xf32>
      %17 = vector.broadcast %16 : vector<1x512xf32> to vector<64x512xf32>
      %18 = arith.addf %15, %17 : vector<64x512xf32>
      %19 = arith.index_cast %12 : i32 to index
      %c0_12 = arith.constant 0 : index
      %c0_13 = arith.constant 0 : index
      %20 = vector.load %arg7[%19, %c0_12, %c0_13] : memref<2x64x512xf32, #tpu.memory_space<vmem>>, vector<1x64x512xf32>
      %21 = vector.shape_cast %20 : vector<1x64x512xf32> to vector<64x512xf32>
      %22 = vector.shape_cast %18 : vector<64x512xf32> to vector<1x64x512xf32>
      tpu.vector_store %arg7[%19, %c0_12, %c0_13], %22 {strides = array<i32>} : memref<2x64x512xf32, #tpu.memory_space<vmem>>, vector<1x64x512xf32>,
    } else {
    }
    %c0_i32_2 = arith.constant 0 : i32
    %6 = arith.cmpi sgt, %arg1, %c0_i32_2 : i32
    %7 = arith.extui %6 : i1 to i32
    %c0_i32_3 = arith.constant 0 : i32
    %8 = arith.cmpi ne, %7, %c0_i32_3 : i32
    scf.if %8 {
      %c1_i32_6 = arith.constant 1 : i32
      %12 = arith.subi %arg1, %c1_i32_6 : i32
      %c1_i32_7 = arith.constant 1 : i32
      %13 = arith.andi %12, %c1_i32_7 : i32
      %c0 = arith.constant 0 : index
      %c0_8 = arith.constant 0 : index
      %14 = vector.load %arg4[%c0, %c0_8] : memref<128x512xbf16, #tpu.memory_space<vmem>>, vector<128x512xbf16>
      %c0_9 = arith.constant 0 : index
      %c0_10 = arith.constant 0 : index
      %15 = vector.load %arg8[%c0_9, %c0_10] : memref<8x128xf32, #tpu.memory_space<vmem>>, vector<8x128xf32>
      %c0_11 = arith.constant 0 : index
      %c0_12 = arith.constant 0 : index
      %16 = vector.load %arg9[%c0_11, %c0_12] : memref<8x128xf32, #tpu.memory_space<vmem>>, vector<8x128xf32>
      %17 = arith.index_cast %13 : i32 to index
      %c0_13 = arith.constant 0 : index
      %c0_14 = arith.constant 0 : index
      %18 = vector.load %arg7[%17, %c0_13, %c0_14] : memref<2x64x512xf32, #tpu.memory_space<vmem>>, vector<1x8x512xf32>
      %19 = vector.shape_cast %18 : vector<1x8x512xf32> to vector<8x512xf32>
      %20 = arith.truncf %15 : vector<8x128xf32> to vector<8x128xbf16>
      %cst = arith.constant dense<0.000000e+00> : vector<8x512xf32>
      %21 = tpu.matmul %20, %14, %cst {dimension_numbers = #tpu.dot_dimension_numbers<[1], [0], [0], [1], [0, 0, 1, 1], [], []>} : vector<8x128xbf16>, vector<128x512xbf16>, vector<8x512xf32> -> vector<8x512xf32>
      %22 = arith.addf %19, %21 : vector<8x512xf32>
      %23 = vector.extract_strided_slice %22 {offsets = [0, 0], sizes = [8, 384], strides = [1, 1]} : vector<8x512xf32> to vector<8x384xf32>
      %24 = arith.negf %23 : vector<8x384xf32>
      %25 = math.exp %24 : vector<8x384xf32>
      %cst_15 = arith.constant 1.000000e+00 : f32
      %26 = vector.broadcast %cst_15 : f32 to vector<8x384xf32>
      %27 = arith.addf %26, %25 : vector<8x384xf32>
      %28 = arith.divf %26, %27 : vector<8x384xf32>
      %29 = vector.extract_strided_slice %28 {offsets = [0, 0], sizes = [8, 128], strides = [1, 1]} : vector<8x384xf32> to vector<8x128xf32>
      %30 = vector.extract_strided_slice %28 {offsets = [0, 128], sizes = [8, 128], strides = [1, 1]} : vector<8x384xf32> to vector<8x128xf32>
      %31 = vector.extract_strided_slice %28 {offsets = [0, 256], sizes = [8, 128], strides = [1, 1]} : vector<8x384xf32> to vector<8x128xf32>
      %32 = vector.extract_strided_slice %22 {offsets = [0, 384], sizes = [8, 128], strides = [1, 1]} : vector<8x512xf32> to vector<8x128xf32>
      %33 = math.tanh %32 : vector<8x128xf32>
      %34 = arith.mulf %30, %16 : vector<8x128xf32>
      %35 = arith.mulf %29, %33 : vector<8x128xf32>
      %36 = arith.addf %34, %35 : vector<8x128xf32>
      %37 = math.tanh %36 : vector<8x128xf32>
      %38 = arith.mulf %31, %37 : vector<8x128xf32>
      %39 = arith.index_cast %13 : i32 to index
      %c8 = arith.constant 8 : index
      %c0_16 = arith.constant 0 : index
      %40 = vector.load %arg7[%39, %c8, %c0_16] : memref<2x64x512xf32, #tpu.memory_space<vmem>>, vector<1x8x512xf32>
      %41 = vector.shape_cast %40 : vector<1x8x512xf32> to vector<8x512xf32>
      %42 = arith.truncf %38 : vector<8x128xf32> to vector<8x128xbf16>
      %cst_17 = arith.constant dense<0.000000e+00> : vector<8x512xf32>
      %43 = tpu.matmul %42, %14, %cst_17 {dimension_numbers = #tpu.dot_dimension_numbers<[1], [0], [0], [1], [0, 0, 1, 1], [], []>} : vector<8x128xbf16>, vector<128x512xbf16>, vector<8x512xf32> -> vector<8x512xf32>
      %44 = arith.addf %41, %43 : vector<8x512xf32>
      %45 = vector.extract_strided_slice %44 {offsets = [0, 0], sizes = [8, 384], strides = [1, 1]} : vector<8x512xf32> to vector<8x384xf32>
      %46 = arith.negf %45 : vector<8x384xf32>
      %47 = math.exp %46 : vector<8x384xf32>
      %cst_18 = arith.constant 1.000000e+00 : f32
      %48 = vector.broadcast %cst_18 : f32 to vector<8x384xf32>
      %49 = arith.addf %48, %47 : vector<8x384xf32>
      %50 = arith.divf %48, %49 : vector<8x384xf32>
      %51 = vector.extract_strided_slice %50 {offsets = [0, 0], sizes = [8, 128], strides = [1, 1]} : vector<8x384xf32> to vector<8x128xf32>
      %52 = vector.extract_strided_slice %50 {offsets = [0, 128], sizes = [8, 128], strides = [1, 1]} : vector<8x384xf32> to vector<8x128xf32>
      %53 = vector.extract_strided_slice %50 {offsets = [0, 256], sizes = [8, 128], strides = [1, 1]} : vector<8x384xf32> to vector<8x128xf32>
      %54 = vector.extract_strided_slice %44 {offsets = [0, 384], sizes = [8, 128], strides = [1, 1]} : vector<8x512xf32> to vector<8x128xf32>
      %55 = math.tanh %54 : vector<8x128xf32>
      %56 = arith.mulf %52, %36 : vector<8x128xf32>
      %57 = arith.mulf %51, %55 : vector<8x128xf32>
      %58 = arith.addf %56, %57 : vector<8x128xf32>
      %59 = math.tanh %58 : vector<8x128xf32>
      %60 = arith.mulf %53, %59 : vector<8x128xf32>
      %61 = arith.index_cast %13 : i32 to index
      %c16 = arith.constant 16 : index
      %c0_19 = arith.constant 0 : index
      %62 = vector.load %arg7[%61, %c16, %c0_19] : memref<2x64x512xf32, #tpu.memory_space<vmem>>, vector<1x8x512xf32>
      %63 = vector.shape_cast %62 : vector<1x8x512xf32> to vector<8x512xf32>
      %64 = arith.truncf %60 : vector<8x128xf32> to vector<8x128xbf16>
      %cst_20 = arith.constant dense<0.000000e+00> : vector<8x512xf32>
      %65 = tpu.matmul %64, %14, %cst_20 {dimension_numbers = #tpu.dot_dimension_numbers<[1], [0], [0], [1], [0, 0, 1, 1], [], []>} : vector<8x128xbf16>, vector<128x512xbf16>, vector<8x512xf32> -> vector<8x512xf32>
      %66 = arith.addf %63, %65 : vector<8x512xf32>
      %67 = vector.extract_strided_slice %66 {offsets = [0, 0], sizes = [8, 384], strides = [1, 1]} : vector<8x512xf32> to vector<8x384xf32>
      %68 = arith.negf %67 : vector<8x384xf32>
      %69 = math.exp %68 : vector<8x384xf32>
      %cst_21 = arith.constant 1.000000e+00 : f32
      %70 = vector.broadcast %cst_21 : f32 to vector<8x384xf32>
      %71 = arith.addf %70, %69 : vector<8x384xf32>
      %72 = arith.divf %70, %71 : vector<8x384xf32>
      %73 = vector.extract_strided_slice %72 {offsets = [0, 0], sizes = [8, 128], strides = [1, 1]} : vector<8x384xf32> to vector<8x128xf32>
      %74 = vector.extract_strided_slice %72 {offsets = [0, 128], sizes = [8, 128], strides = [1, 1]} : vector<8x384xf32> to vector<8x128xf32>
      %75 = vector.extract_strided_slice %72 {offsets = [0, 256], sizes = [8, 128], strides = [1, 1]} : vector<8x384xf32> to vector<8x128xf32>
      %76 = vector.extract_strided_slice %66 {offsets = [0, 384], sizes = [8, 128], strides = [1, 1]} : vector<8x512xf32> to vector<8x128xf32>
      %77 = math.tanh %76 : vector<8x128xf32>
      %78 = arith.mulf %74, %58 : vector<8x128xf32>
      %79 = arith.mulf %73, %77 : vector<8x128xf32>
      %80 = arith.addf %78, %79 : vector<8x128xf32>
      %81 = math.tanh %80 : vector<8x128xf32>
      %82 = arith.mulf %75, %81 : vector<8x128xf32>
      %83 = arith.index_cast %13 : i32 to index
      %c24 = arith.constant 24 : index
      %c0_22 = arith.constant 0 : index
      %84 = vector.load %arg7[%83, %c24, %c0_22] : memref<2x64x512xf32, #tpu.memory_space<vmem>>, vector<1x8x512xf32>
      %85 = vector.shape_cast %84 : vector<1x8x512xf32> to vector<8x512xf32>
      %86 = arith.truncf %82 : vector<8x128xf32> to vector<8x128xbf16>
      %cst_23 = arith.constant dense<0.000000e+00> : vector<8x512xf32>
      %87 = tpu.matmul %86, %14, %cst_23 {dimension_numbers = #tpu.dot_dimension_numbers<[1], [0], [0], [1], [0, 0, 1, 1], [], []>} : vector<8x128xbf16>, vector<128x512xbf16>, vector<8x512xf32> -> vector<8x512xf32>
      %88 = arith.addf %85, %87 : vector<8x512xf32>
      %89 = vector.extract_strided_slice %88 {offsets = [0, 0], sizes = [8, 384], strides = [1, 1]} : vector<8x512xf32> to vector<8x384xf32>
      %90 = arith.negf %89 : vector<8x384xf32>
      %91 = math.exp %90 : vector<8x384xf32>
      %cst_24 = arith.constant 1.000000e+00 : f32
      %92 = vector.broadcast %cst_24 : f32 to vector<8x384xf32>
      %93 = arith.addf %92, %91 : vector<8x384xf32>
      %94 = arith.divf %92, %93 : vector<8x384xf32>
      %95 = vector.extract_strided_slice %94 {offsets = [0, 0], sizes = [8, 128], strides = [1, 1]} : vector<8x384xf32> to vector<8x128xf32>
      %96 = vector.extract_strided_slice %94 {offsets = [0, 128], sizes = [8, 128], strides = [1, 1]} : vector<8x384xf32> to vector<8x128xf32>
      %97 = vector.extract_strided_slice %94 {offsets = [0, 256], sizes = [8, 128], strides = [1, 1]} : vector<8x384xf32> to vector<8x128xf32>
      %98 = vector.extract_strided_slice %88 {offsets = [0, 384], sizes = [8, 128], strides = [1, 1]} : vector<8x512xf32> to vector<8x128xf32>
      %99 = math.tanh %98 : vector<8x128xf32>
      %100 = arith.mulf %96, %80 : vector<8x128xf32>
      %101 = arith.mulf %95, %99 : vector<8x128xf32>
      %102 = arith.addf %100, %101 : vector<8x128xf32>
      %103 = math.tanh %102 : vector<8x128xf32>
      %104 = arith.mulf %97, %103 : vector<8x128xf32>
      %105 = arith.index_cast %13 : i32 to index
      %c32 = arith.constant 32 : index
      %c0_25 = arith.constant 0 : index
      %106 = vector.load %arg7[%105, %c32, %c0_25] : memref<2x64x512xf32, #tpu.memory_space<vmem>>, vector<1x8x512xf32>
      %107 = vector.shape_cast %106 : vector<1x8x512xf32> to vector<8x512xf32>
      %108 = arith.truncf %104 : vector<8x128xf32> to vector<8x128xbf16>
      %cst_26 = arith.constant dense<0.000000e+00> : vector<8x512xf32>
      %109 = tpu.matmul %108, %14, %cst_26 {dimension_numbers = #tpu.dot_dimension_numbers<[1], [0], [0], [1], [0, 0, 1, 1], [], []>} : vector<8x128xbf16>, vector<128x512xbf16>, vector<8x512xf32> -> vector<8x512xf32>
      %110 = arith.addf %107, %109 : vector<8x512xf32>
      %111 = vector.extract_strided_slice %110 {offsets = [0, 0], sizes = [8, 384], strides = [1, 1]} : vector<8x512xf32> to vector<8x384xf32>
      %112 = arith.negf %111 : vector<8x384xf32>
      %113 = math.exp %112 : vector<8x384xf32>
      %cst_27 = arith.constant 1.000000e+00 : f32
      %114 = vector.broadcast %cst_27 : f32 to vector<8x384xf32>
      %115 = arith.addf %114, %113 : vector<8x384xf32>
      %116 = arith.divf %114, %115 : vector<8x384xf32>
      %117 = vector.extract_strided_slice %116 {offsets = [0, 0], sizes = [8, 128], strides = [1, 1]} : vector<8x384xf32> to vector<8x128xf32>
      %118 = vector.extract_strided_slice %116 {offsets = [0, 128], sizes = [8, 128], strides = [1, 1]} : vector<8x384xf32> to vector<8x128xf32>
      %119 = vector.extract_strided_slice %116 {offsets = [0, 256], sizes = [8, 128], strides = [1, 1]} : vector<8x384xf32> to vector<8x128xf32>
      %120 = vector.extract_strided_slice %110 {offsets = [0, 384], sizes = [8, 128], strides = [1, 1]} : vector<8x512xf32> to vector<8x128xf32>
      %121 = math.tanh %120 : vector<8x128xf32>
      %122 = arith.mulf %118, %102 : vector<8x128xf32>
      %123 = arith.mulf %117, %121 : vector<8x128xf32>
      %124 = arith.addf %122, %123 : vector<8x128xf32>
      %125 = math.tanh %124 : vector<8x128xf32>
      %126 = arith.mulf %119, %125 : vector<8x128xf32>
      %127 = arith.index_cast %13 : i32 to index
      %c40 = arith.constant 40 : index
      %c0_28 = arith.constant 0 : index
      %128 = vector.load %arg7[%127, %c40, %c0_28] : memref<2x64x512xf32, #tpu.memory_space<vmem>>, vector<1x8x512xf32>
      %129 = vector.shape_cast %128 : vector<1x8x512xf32> to vector<8x512xf32>
      %130 = arith.truncf %126 : vector<8x128xf32> to vector<8x128xbf16>
      %cst_29 = arith.constant dense<0.000000e+00> : vector<8x512xf32>
      %131 = tpu.matmul %130, %14, %cst_29 {dimension_numbers = #tpu.dot_dimension_numbers<[1], [0], [0], [1], [0, 0, 1, 1], [], []>} : vector<8x128xbf16>, vector<128x512xbf16>, vector<8x512xf32> -> vector<8x512xf32>
      %132 = arith.addf %129, %131 : vector<8x512xf32>
      %133 = vector.extract_strided_slice %132 {offsets = [0, 0], sizes = [8, 384], strides = [1, 1]} : vector<8x512xf32> to vector<8x384xf32>
      %134 = arith.negf %133 : vector<8x384xf32>
      %135 = math.exp %134 : vector<8x384xf32>
      %cst_30 = arith.constant 1.000000e+00 : f32
      %136 = vector.broadcast %cst_30 : f32 to vector<8x384xf32>
      %137 = arith.addf %136, %135 : vector<8x384xf32>
      %138 = arith.divf %136, %137 : vector<8x384xf32>
      %139 = vector.extract_strided_slice %138 {offsets = [0, 0], sizes = [8, 128], strides = [1, 1]} : vector<8x384xf32> to vector<8x128xf32>
      %140 = vector.extract_strided_slice %138 {offsets = [0, 128], sizes = [8, 128], strides = [1, 1]} : vector<8x384xf32> to vector<8x128xf32>
      %141 = vector.extract_strided_slice %138 {offsets = [0, 256], sizes = [8, 128], strides = [1, 1]} : vector<8x384xf32> to vector<8x128xf32>
      %142 = vector.extract_strided_slice %132 {offsets = [0, 384], sizes = [8, 128], strides = [1, 1]} : vector<8x512xf32> to vector<8x128xf32>
      %143 = math.tanh %142 : vector<8x128xf32>
      %144 = arith.mulf %140, %124 : vector<8x128xf32>
      %145 = arith.mulf %139, %143 : vector<8x128xf32>
      %146 = arith.addf %144, %145 : vector<8x128xf32>
      %147 = math.tanh %146 : vector<8x128xf32>
      %148 = arith.mulf %141, %147 : vector<8x128xf32>
      %149 = arith.index_cast %13 : i32 to index
      %c48 = arith.constant 48 : index
      %c0_31 = arith.constant 0 : index
      %150 = vector.load %arg7[%149, %c48, %c0_31] : memref<2x64x512xf32, #tpu.memory_space<vmem>>, vector<1x8x512xf32>
      %151 = vector.shape_cast %150 : vector<1x8x512xf32> to vector<8x512xf32>
      %152 = arith.truncf %148 : vector<8x128xf32> to vector<8x128xbf16>
      %cst_32 = arith.constant dense<0.000000e+00> : vector<8x512xf32>
      %153 = tpu.matmul %152, %14, %cst_32 {dimension_numbers = #tpu.dot_dimension_numbers<[1], [0], [0], [1], [0, 0, 1, 1], [], []>} : vector<8x128xbf16>, vector<128x512xbf16>, vector<8x512xf32> -> vector<8x512xf32>
      %154 = arith.addf %151, %153 : vector<8x512xf32>
      %155 = vector.extract_strided_slice %154 {offsets = [0, 0], sizes = [8, 384], strides = [1, 1]} : vector<8x512xf32> to vector<8x384xf32>
      %156 = arith.negf %155 : vector<8x384xf32>
      %157 = math.exp %156 : vector<8x384xf32>
      %cst_33 = arith.constant 1.000000e+00 : f32
      %158 = vector.broadcast %cst_33 : f32 to vector<8x384xf32>
      %159 = arith.addf %158, %157 : vector<8x384xf32>
      %160 = arith.divf %158, %159 : vector<8x384xf32>
      %161 = vector.extract_strided_slice %160 {offsets = [0, 0], sizes = [8, 128], strides = [1, 1]} : vector<8x384xf32> to vector<8x128xf32>
      %162 = vector.extract_strided_slice %160 {offsets = [0, 128], sizes = [8, 128], strides = [1, 1]} : vector<8x384xf32> to vector<8x128xf32>
      %163 = vector.extract_strided_slice %160 {offsets = [0, 256], sizes = [8, 128], strides = [1, 1]} : vector<8x384xf32> to vector<8x128xf32>
      %164 = vector.extract_strided_slice %154 {offsets = [0, 384], sizes = [8, 128], strides = [1, 1]} : vector<8x512xf32> to vector<8x128xf32>
      %165 = math.tanh %164 : vector<8x128xf32>
      %166 = arith.mulf %162, %146 : vector<8x128xf32>
      %167 = arith.mulf %161, %165 : vector<8x128xf32>
      %168 = arith.addf %166, %167 : vector<8x128xf32>
      %169 = math.tanh %168 : vector<8x128xf32>
      %170 = arith.mulf %163, %169 : vector<8x128xf32>
      %171 = arith.index_cast %13 : i32 to index
      %c56 = arith.constant 56 : index
      %c0_34 = arith.constant 0 : index
      %172 = vector.load %arg7[%171, %c56, %c0_34] : memref<2x64x512xf32, #tpu.memory_space<vmem>>, vector<1x8x512xf32>
      %173 = vector.shape_cast %172 : vector<1x8x512xf32> to vector<8x512xf32>
      %174 = arith.truncf %170 : vector<8x128xf32> to vector<8x128xbf16>
      %cst_35 = arith.constant dense<0.000000e+00> : vector<8x512xf32>
      %175 = tpu.matmul %174, %14, %cst_35 {dimension_numbers = #tpu.dot_dimension_numbers<[1], [0], [0], [1], [0, 0, 1, 1], [], []>} : vector<8x128xbf16>, vector<128x512xbf16>, vector<8x512xf32> -> vector<8x512xf32>
      %176 = arith.addf %173, %175 : vector<8x512xf32>
      %177 = vector.extract_strided_slice %176 {offsets = [0, 0], sizes = [8, 384], strides = [1, 1]} : vector<8x512xf32> to vector<8x384xf32>
      %178 = arith.negf %177 : vector<8x384xf32>
      %179 = math.exp %178 : vector<8x384xf32>
      %cst_36 = arith.constant 1.000000e+00 : f32
      %180 = vector.broadcast %cst_36 : f32 to vector<8x384xf32>
      %181 = arith.addf %180, %179 : vector<8x384xf32>
      %182 = arith.divf %180, %181 : vector<8x384xf32>
      %183 = vector.extract_strided_slice %182 {offsets = [0, 0], sizes = [8, 128], strides = [1, 1]} : vector<8x384xf32> to vector<8x128xf32>
      %184 = vector.extract_strided_slice %182 {offsets = [0, 128], sizes = [8, 128], strides = [1, 1]} : vector<8x384xf32> to vector<8x128xf32>
      %185 = vector.extract_strided_slice %182 {offsets = [0, 256], sizes = [8, 128], strides = [1, 1]} : vector<8x384xf32> to vector<8x128xf32>
      %186 = vector.extract_strided_slice %176 {offsets = [0, 384], sizes = [8, 128], strides = [1, 1]} : vector<8x512xf32> to vector<8x128xf32>
      %187 = math.tanh %186 : vector<8x128xf32>
      %188 = arith.mulf %184, %168 : vector<8x128xf32>
      %189 = arith.mulf %183, %187 : vector<8x128xf32>
      %190 = arith.addf %188, %189 : vector<8x128xf32>
      %191 = math.tanh %190 : vector<8x128xf32>
      %192 = arith.mulf %185, %191 : vector<8x128xf32>
      %c0_37 = arith.constant 0 : index
      %c0_38 = arith.constant 0 : index
      %193 = vector.load %arg8[%c0_37, %c0_38] : memref<8x128xf32, #tpu.memory_space<vmem>>, vector<8x128xf32>
      tpu.vector_store %arg8[%c0_37, %c0_38], %192 {strides = array<i32>} : memref<8x128xf32, #tpu.memory_space<vmem>>, vector<8x128xf32>,
      %c0_39 = arith.constant 0 : index
      %c0_40 = arith.constant 0 : index
      %194 = vector.load %arg9[%c0_39, %c0_40] : memref<8x128xf32, #tpu.memory_space<vmem>>, vector<8x128xf32>
      tpu.vector_store %arg9[%c0_39, %c0_40], %190 {strides = array<i32>} : memref<8x128xf32, #tpu.memory_space<vmem>>, vector<8x128xf32>,
    } else {
    }
    %c1_i32_4 = arith.constant 1 : i32
    %9 = arith.cmpi eq, %arg1, %c1_i32_4 : i32
    %10 = arith.extui %9 : i1 to i32
    %c0_i32_5 = arith.constant 0 : i32
    %11 = arith.cmpi ne, %10, %c0_i32_5 : i32
    scf.if %11 {
      %c0 = arith.constant 0 : index
      %c0_6 = arith.constant 0 : index
      %12 = vector.load %arg8[%c0, %c0_6] : memref<8x128xf32, #tpu.memory_space<vmem>>, vector<8x128xf32>
      %c0_7 = arith.constant 0 : index
      %c0_8 = arith.constant 0 : index
      %13 = vector.load %arg6[%c0_7, %c0_8] : memref<8x128xf32, #tpu.memory_space<vmem>>, vector<8x128xf32>
      tpu.vector_store %arg6[%c0_7, %c0_8], %12 {strides = array<i32>} : memref<8x128xf32, #tpu.memory_space<vmem>>, vector<8x128xf32>,
    } else {
    }
    return
  }
  func.func @transform_0(%arg0: i32, %arg1: i32) -> (i32, i32) {
    %c1_i32 = arith.constant 1 : i32
    %0 = arith.muli %arg0, %c1_i32 : i32
    %c0_i32 = arith.constant 0 : i32
    %1 = arith.minsi %arg1, %c0_i32 : i32
    %2 = arith.addi %0, %1 : i32
    %c0_i32_0 = arith.constant 0 : i32
    %c0_i32_1 = arith.constant 0 : i32
    return %2, %c0_i32_0 : i32, i32
  }
  func.func @transform_1(%arg0: i32, %arg1: i32) -> (i32, i32) {
    %c0_i32 = arith.constant 0 : i32
    %c0_i32_0 = arith.constant 0 : i32
    %c0_i32_1 = arith.constant 0 : i32
    return %c0_i32, %c0_i32_0 : i32, i32
  }
  func.func @transform_2(%arg0: i32, %arg1: i32) -> (i32, i32) {
    %c0_i32 = arith.constant 0 : i32
    %c0_i32_0 = arith.constant 0 : i32
    %c0_i32_1 = arith.constant 0 : i32
    return %c0_i32, %c0_i32_0 : i32, i32
  }
  func.func @transform_3(%arg0: i32, %arg1: i32) -> (i32, i32) {
    %c0_i32 = arith.constant 0 : i32
    %c0_i32_0 = arith.constant 0 : i32
    %c0_i32_1 = arith.constant 0 : i32
    return %c0_i32, %c0_i32_0 : i32, i32
  }
  func.func @transform_4(%arg0: i32, %arg1: i32) -> (i32, i32) {
    %c0_i32 = arith.constant 0 : i32
    %c0_i32_0 = arith.constant 0 : i32
    return %arg0, %c0_i32 : i32, i32
  }
}

</mosaic_0001>

<bundles_post_ra>
// kernel: lstm_model_forward.3
= control target key start
LH: loop header
LB: loop body
LE: loop exit
PB: predicated region body
PF: predicated region fallthrough
CT: control target
= control target key end

     0   :  { %v467_v3 = vmov 0.0|0.0   ;;  %vm468_vm0 = vmmov 0   ;;  %v469_v6 = vmov 0.0   ;;  %s650_s0 = inlined_call_operand.vmem [shape: f32[2,128], index: 0, kind: input, shape index: {}]   ;;  %s651_s1 = inlined_call_operand.vmem [shape: f32[128,128], index: 1, kind: input, shape index: {}]   ;;  %s652_s2 = inlined_call_operand.vmem [shape: f32[1,128], index: 2, kind: input, shape index: {}]   ;;  %s653_s3 = inlined_call_operand.vmem [shape: f32[1,128], index: 3, kind: input, shape index: {}]   ;;  %s654_s4 = inlined_call_operand.vmem [shape: f32[1,128], index: 4, kind: input, shape index: {}]   ;;  %s655_s5 = inlined_call_operand.vmem [shape: f32[128,2], index: 5, kind: input, shape index: {}]   ;;  %s656_s6 = inlined_call_operand.vmem [shape: f32[1,2], index: 6, kind: input, shape index: {}]   ;;  %s657_s7 = inlined_call_operand.hbm [shape: f32[2,2], index: 7, kind: output, shape index: {}]  }
   0x1   :  { %v28_v0 = vld [vmem:[%s651_s1] sm:$0xff]  ;;  %v29_v1 = vld [vmem:[%s651_s1 + $0x8] sm:$0xff]  ;;  %v30_v2 = vld [vmem:[%s651_s1 + $0x10] sm:$0xff]  ;;  %385 = vmatprep.subr.bf16.mxu0 %v467_v3  ;;  %347 = vmatprep.mubr.msk.f32.mxu0 %vm468_vm0, %v469_v6 }
   0x2   :  { %v386_v4 = vpack.c.bf16 %v29_v1, %v28_v0  ;;  %v31_v5 = vld [vmem:[%s651_s1 + $0x18] sm:$0xff]  ;;  %409 = vmatprep.subr.bf16.mxu1 %v467_v3  ;;  %382 = vmatprep.mubr.msk.f32.mxu1 %vm468_vm0, %v469_v6  ;;  %v32_v8 = vld [vmem:[%s651_s1 + $0x20] sm:$0xff]  ;;  %v33_v9 = vld [vmem:[%s651_s1 + $0x28] sm:$0xff] }
   0x3   :  { %v389_v7 = vpack.c.bf16 %v31_v5, %v30_v2 }
   0x4   :  { %387 = vmatpush3.bf16.msra.mxu0 %v386_v4 }
   0x5   :  { %388 = vmatprep.subr.bf16.mxu0 %v467_v3 }
   0x6   :  { %12 = vsyncpa [#allocation3], 0  ;;  %v392_v10 = vpack.c.bf16 %v33_v9, %v32_v8  ;;  %v34_v11 = vld [vmem:[%s651_s1 + $0x30] sm:$0xff]  ;;  %v35_v12 = vld [vmem:[%s651_s1 + $0x38] sm:$0xff]  ;;  %vm122_vm1 = vcmask 1041408   ;;  %vm260_vm2 = vcmask 9216  }
   0x7   :  { %v395_v13 = vpack.c.bf16 %v35_v12, %v34_v11  ;;  %v36_v14 = vld [vmem:[%s651_s1 + $0x40] sm:$0xff]  ;;  %v37_v15 = vld [vmem:[%s651_s1 + $0x48] sm:$0xff]  ;;  %v38_v17 = vld [vmem:[%s651_s1 + $0x50] sm:$0xff] }
   0x8   :  { %390 = vmatpush3.bf16.msra.mxu0 %v389_v7  ;;  %v398_v16 = vpack.c.bf16 %v37_v15, %v36_v14  ;;  %v39_v18 = vld [vmem:[%s651_s1 + $0x58] sm:$0xff]  ;;  %v40_v20 = vld [vmem:[%s651_s1 + $0x60] sm:$0xff]  ;;  %v41_v21 = vld [vmem:[%s651_s1 + $0x68] sm:$0xff] }
   0x9   :  { %391 = vmatprep.subr.bf16.mxu0 %v467_v3  ;;  %v401_v19 = vpack.c.bf16 %v39_v18, %v38_v17  ;;  %v404_v22 = vpack.c.bf16 %v41_v21, %v40_v20  ;;  %v42_v23 = vld [vmem:[%s651_s1 + $0x70] sm:$0xff]  ;;  %v43_v24 = vld [vmem:[%s651_s1 + $0x78] sm:$0xff]  ;;  %v27_v26 = vld [vmem:[%s650_s0] sm:$0x3] }
   0xa   :  { %v407_v25 = vpack.c.bf16 %v43_v24, %v42_v23  ;;  %v161_v27 = vld [vmem:[%s655_s5] sm:$0xff]  ;;  %v162_v28 = vld [vmem:[%s655_s5 + $0x8] sm:$0xff]  ;;  %v163_v30 = vld [vmem:[%s655_s5 + $0x10] sm:$0xff] }
   0xb   :  { %v410_v29 = vpack.c.bf16 %v162_v28, %v161_v27  ;;  %v164_v31 = vld [vmem:[%s655_s5 + $0x18] sm:$0xff]  ;;  %v165_v33 = vld [vmem:[%s655_s5 + $0x20] sm:$0xff]  ;;  %v166_v34 = vld [vmem:[%s655_s5 + $0x28] sm:$0xff] }
   0xc   :  { %393 = vmatpush3.bf16.msra.mxu0 %v392_v10  ;;  %v413_v32 = vpack.c.bf16 %v164_v31, %v163_v30  ;;  %v416_v35 = vpack.c.bf16 %v166_v34, %v165_v33  ;;  %v167_v36 = vld [vmem:[%s655_s5 + $0x30] sm:$0xff]  ;;  %v168_v37 = vld [vmem:[%s655_s5 + $0x38] sm:$0xff]  ;;  %v169_v39 = vld [vmem:[%s655_s5 + $0x40] sm:$0xff] }
   0xd   :  { %394 = vmatprep.subr.bf16.mxu0 %v467_v3  ;;  %411 = vmatpush3.bf16.msra.mxu1 %v410_v29  ;;  %v419_v38 = vpack.c.bf16 %v168_v37, %v167_v36  ;;  %v170_v40 = vld [vmem:[%s655_s5 + $0x48] sm:$0xff]  ;;  %v171_v42 = vld [vmem:[%s655_s5 + $0x50] sm:$0xff]  ;;  %v172_v43 = vld [vmem:[%s655_s5 + $0x58] sm:$0xff] }
   0xe   :  { %412 = vmatprep.subr.bf16.mxu1 %v467_v3  ;;  %v422_v41 = vpack.c.bf16 %v170_v40, %v169_v39  ;;  %v425_v44 = vpack.c.bf16 %v172_v43, %v171_v42  ;;  %v173_v45 = vld [vmem:[%s655_s5 + $0x60] sm:$0xff]  ;;  %v174_v46 = vld [vmem:[%s655_s5 + $0x68] sm:$0xff]  ;;  %v175_v48 = vld [vmem:[%s655_s5 + $0x70] sm:$0xff] }
   0xf   :  { %v428_v47 = vpack.c.bf16 %v174_v46, %v173_v45  ;;  %v176_v49 = vld [vmem:[%s655_s5 + $0x78] sm:$0xff]  ;;  %v276_v51 = vld [vmem:[%s652_s2] ss:$0 sm:$0xff] }
  0x10   :  { %396 = vmatpush3.bf16.msra.mxu0 %v395_v13  ;;  %v431_v50 = vpack.c.bf16 %v176_v49, %v175_v48  ;;  %v277_v12 = vld [vmem:[%s653_s3] ss:$0 sm:$0xff]  ;;  %s470_s3 = smov [#allocation2]  }
  0x11   :  { %397 = vmatprep.subr.bf16.mxu0 %v467_v3  ;;  %414 = vmatpush3.bf16.msra.mxu1 %v413_v32  ;;  %v278_v14 = vld [vmem:[%s654_s4] ss:$0 sm:$0xff]  ;;  %s268_s23 = sshll.u32 %s470_s3, 4  ;;  %s269_s23 = int_to_ptr.vmem [resolvable:$true] %s268_s23 }
  0x12   :  { %415 = vmatprep.subr.bf16.mxu1 %v467_v3  ;;  %v279_v17 = vld [vmem:[%s656_s6] ss:$0 sm:$0xff]  ;;  %s443_s4 = scalar_lea.vmem %s269_s23, 32  ;;  %p448_p1 = scmp.lt.s32.totalorder %s269_s23, %s269_s23 }
  0x13   :  { %p444_p0 = scmp.ne.s32.totalorder %s269_s23, %s443_s4  ;;  %p449_p2 = scmp.lt.s32.totalorder %s443_s4, %s443_s4 }
  0x14   :  { %399 = vmatpush3.bf16.msra.mxu0 %v398_v16 }
  0x15   :  { %400 = vmatprep.subr.bf16.mxu0 %v467_v3  ;;  %417 = vmatpush3.bf16.msra.mxu1 %v416_v35  ;;  %p450_p3 = por %p449_p2, %p448_p1 }
  0x16   :  { %418 = vmatprep.subr.bf16.mxu1 %v467_v3 }
  0x17   :  { %p451_p4 = pnand %p450_p3, %p444_p0 }
  0x18   :  { %402 = vmatpush3.bf16.msra.mxu0 %v401_v19 }
  0x19   :  { %403 = vmatprep.subr.bf16.mxu0 %v467_v3  ;;  %420 = vmatpush3.bf16.msra.mxu1 %v419_v38 }
  0x1a   :  { %421 = vmatprep.subr.bf16.mxu1 %v467_v3 }
  0x1c   :  { %405 = vmatpush3.bf16.msra.mxu0 %v404_v22 }
  0x1d   :  { %406 = vmatprep.subr.bf16.mxu0 %v467_v3  ;;  %423 = vmatpush3.bf16.msra.mxu1 %v422_v41 }
  0x1e   :  { %424 = vmatprep.subr.bf16.mxu1 %v467_v3 }
  0x20   :  { %408 = vmatpush3.bf16.msra.mxu0 %v407_v25 }
  0x21   :  { %426 = vmatpush3.bf16.msra.mxu1 %v425_v44 }
  0x22   :  { %427 = vmatprep.subr.bf16.mxu1 %v467_v3 }
  0x23   :  { %348 = vmatmul.mubr.f32.vlgmr.msra.gmra.mrb[0].mxu0 %v27_v26 }
  0x25   :  { %429 = vmatpush3.bf16.msra.mxu1 %v428_v47 }
  0x26   :  { %430 = vmatprep.subr.bf16.mxu1 %v467_v3 }
  0x29   :  { %432 = vmatpush3.bf16.msra.mxu1 %v431_v50 }
  0xf6   :  { %v117_v52 = vpop.f32.mrb[0].mxu0 }
  0xf7   :  { %v118_v53 = vadd.f32 %v276_v51, %v117_v52  ;;  %v349_v54 = vpop.f32.mrb[1].mxu0 }
  0xf9   :  { %v121_v55 = vmax.f32 %v118_v53, 0.0 }
  0xfb   :  { %v123_v56 = vsel %vm122_vm1, %v121_v55, 0.0 }
  0xfc   :  { %v124_v57 = vrot.slane %v123_v56, 4 }
  0xfe   :  { %v125_v58 = vadd.f32 %v124_v57, %v123_v56 }
 0x100   :  { %v126_v59 = vrot.slane %v125_v58, 2 }
 0x102   :  { %v127_v60 = vadd.f32 %v126_v59, %v125_v58 }
 0x104   :  { %v128_v61 = vrot.slane %v127_v60, 1 }
 0x106   :  { %v129_v62 = vadd.f32 %v128_v61, %v127_v60 }
 0x108   :  { %v131_v63 = vmul.f32 0.5, %v129_v62 }
 0x10a   :  { %v132_v0 = vsub.f32 %v121_v55, %v131_v63 }
 0x10c   :  { %v133_v1 = vmul.f32 %v132_v0, %v132_v0 }
 0x10e   :  { %v134_v2 = vsel %vm122_vm1, %v133_v1, 0.0 }
 0x10f   :  { %v135_v3 = vrot.slane %v134_v2, 4 }
 0x111   :  { %v136_v4 = vadd.f32 %v135_v3, %v134_v2 }
 0x113   :  { %v137_v5 = vrot.slane %v136_v4, 2 }
 0x115   :  { %v138_v6 = vadd.f32 %v137_v5, %v136_v4 }
 0x117   :  { %v139_v7 = vrot.slane %v138_v6, 1 }
 0x119   :  { %v140_v8 = vadd.f32 %v139_v7, %v138_v6 }
 0x11b   :  { %v141_v9 = vmul.f32 0.5, %v140_v8 }
 0x11d   :  { %v142_v10 = vadd.f32 1e-05, %v141_v9 }
 0x11f   :  { %437 = vrsqrt.f32 %v142_v10 }
 0x129   :  { %v438_v11 = vpop.eup %437 }
 0x12a   :  { %v144_v13 = vmul.f32 %v438_v11, %v132_v0 }
 0x12c   :  { %v152_v15 = vmul.f32 %v277_v12, %v144_v13 }
 0x12e   :  { %v160_v16 = vadd.f32 %v278_v14, %v152_v15 }
 0x130   :  { %383 = vmatmul.mubr.f32.vlgmr.msra.gmra.mrb[0].mxu1 %v160_v16 }
 0x203   :  { %v250_v18 = vpop.f32.mrb[0].mxu1 }
 0x204   :  { %v251_v19 = vadd.f32 %v279_v17, %v250_v18  ;;  %v384_v20 = vpop.f32.mrb[1].mxu1 }
 0x206   :  { %v280_v21 = vmul.f32 -1.442695, %v251_v19 }
 0x208   :  { %439 = vpow2.f32 %v280_v21 }
 0x212   :  { %v440_v22 = vpop.eup %439 }
 0x213   :  { %v257_v23 = vadd.f32 1.0, %v440_v22 }
 0x215   :  { %441 = vrcp.f32 %v257_v23 }
 0x21f   :  { %v442_v24 = vpop.eup %441 }
 0x220   :  { %261 = vst.msk [vmem:[#allocation2] sm:$0x3] %vm260_vm2, %v442_v24 }
 0x221   :  { %454 = shalt.err (!%p451_p4)
}
 0x222   :  { %s455_s25 = scalar_lea.hbm %s657_s7, 32 }
 0x223   :  { %p456_p5 = scmp.ne.s32.totalorder %s657_s7, %s455_s25  ;;  %p459_p6 = scmp.lt.u32.totalorder %s455_s25, %s657_s7 }
 0x225   :  { %p461_p7 = pnand %p459_p6, %p456_p5 }
 0x227   :  { %464 = shalt.err (!%p461_p7)
}
 0x228   :  { %271 = dma.vmem_to_hbm [thread:$0]  %s269_s23, 32, %s657_s7, [#allocation3]  }
 0x229   :  { %465 = dma.done.wait [#allocation3], 32  }
 0x22a   :  { %466 = vsyncadd [#allocation3], 4294967264 }
 0x22b   :  { %275 = vsyncpa [#allocation3], 1 }

// kernel: lstm_model_forward.2
= control target key start
LH: loop header
LB: loop body
LE: loop exit
PB: predicated region body
PF: predicated region fallthrough
CT: control target
= control target key end

     0   :  { %s2618_s15 = smov 0   ;;  %s2620_s16 = smov 0   ;;  %s3494_s0 = inlined_call_operand.vmem [shape: bf16[64,256], index: 0, kind: input, shape index: {}]   ;;  %s3495_s1 = inlined_call_operand.vmem [shape: bf16[256,512], index: 1, kind: input, shape index: {}]   ;;  %s3496_s2 = inlined_call_operand.vmem [shape: bf16[128,512], index: 2, kind: input, shape index: {}]   ;;  %s3497_s3 = inlined_call_operand.vmem [shape: f32[1,512], index: 3, kind: input, shape index: {}]   ;;  %s3498_s4 = inlined_call_operand.vmem [shape: f32[8,128], index: 4, kind: output, shape index: {}]  }
   0x1   :  { %s2622_s17 = smov 0  }
   0x2 LB: > { %s23_s18 = sadd.s32 1, %s2585_s16  ;;  %p2078_p0 = scmp.ge.s32.totalorder %s2589_s17, 1  ;;  %s2589_s17 = sphi %s2622_s17, %s14_s17   ;;  %s2585_s16 = sphi %s2620_s16, %s3500_s16   ;;  %s2581_s15 = sphi %s2618_s15, %s3499_s15  }
   0x3   : > { %p24_p1 = scmp.ge.s32.totalorder %s23_s18, 2  ;;  %p188_p2 = scmp.lt.s32.totalorder %s2589_s17, 3 }
   0x5   : > { %s3502_s18 = smov (%p24_p1, %s23_s18), 0  ;;  %p189_p3 = pnand %p2078_p0, %p188_p2 }
   0x6   : > { %p217_p4 = scmp.lt.s32.totalorder (!%p189_p3), %s2581_s15, 0  ;;  %p2082_p6 = scmp.ne.s32.totalorder (!%p189_p3), %s2581_s15, 0 }
   0x7   : > { %192 = sbr.rel (%p189_p3) target bundleno = 2453 (0x995), region = 36 }
   0xe   : > { %s218_s19 = scalar_select %p217_p4, %s2581_s15, 0 }
   0xf   : > { %238 = sbr.rel (%p2082_p6) target bundleno = 22 (0x16), region = 40  ;;  %v2591_v0 = vmov (!%p2082_p6), 0.0  }
  0x10   : > { %s2079_s20 = sshll.u32 %s218_s19, 3  ;;  %239 = vst [vmem:[#allocation3] sm:$0xff] (!%p2082_p6), %v2591_v0  ;;  %240 = vst [vmem:[#allocation4] sm:$0xff] (!%p2082_p6), %v2591_v0 }
  0x11   : > { %p221_p5 = scmp.lt.s32.totalorder %s2079_s20, 7 }
  0x13   : > { %s3504_s20 = smov (!%p221_p5, %s2079_s20), 7 }
  0x14   : > { %s2222_s21 = sshll.u32 %s3504_s20, 3 }
  0x15   : > { %s2643_s24 = scalar_lea.vmem %s3494_s0, %s2222_s21 }
  0x16 PF: > { %p2083_p7 = scmp.ge.s32.totalorder %s2581_s15, 1 }
  0x17   : > { %v2251_v1 = vld [vmem:[%s3495_s1 + $0x4] ss:$16 sps:$4 sm:$0xff] (!%p2083_p7)   ;;  %v2253_v2 = vld [vmem:[%s3495_s1 + $0xc] ss:$16 sps:$4 sm:$0xff] (!%p2083_p7)   ;;  %v2255_v3 = vld [vmem:[%s3495_s1] ss:$16 sps:$4 sm:$0xff] (!%p2083_p7)  }
  0x18   : > { %244 = sbr.rel (%p2083_p7) target bundleno = 330 (0x14a), region = 44  ;;  %700 = vmatprep.subr.bf16.mxu0 (!%p2083_p7), %v2251_v1  ;;  %v2256_v4 = vld [vmem:[%s3495_s1 + $0x8] ss:$16 sps:$4 sm:$0xff] (!%p2083_p7)   ;;  %773 = vmatprep.subr.bf16.mxu1 (!%p2083_p7), %v2253_v2  ;;  %v2257_v5 = vld [vmem:[%s3495_s1 + $0x24] ss:$16 sps:$4 sm:$0xff] (!%p2083_p7)   ;;  %s245_s27 = sand.u32 (!%p2083_p7), 1, %s2581_s15 }
  0x19   : > { %701 = vmatpush1.bf16.msra.mxu0 (!%p2083_p7), %v2255_v3  ;;  %774 = vmatpush1.bf16.msra.mxu1 (!%p2083_p7), %v2256_v4  ;;  %v2259_v6 = vld [vmem:[%s3495_s1 + $0x2c] ss:$16 sps:$4 sm:$0xff] (!%p2083_p7)   ;;  %v2261_v7 = vld [vmem:[%s3495_s1 + $0x20] ss:$16 sps:$4 sm:$0xff] (!%p2083_p7)   ;;  %v2262_v8 = vld [vmem:[%s3495_s1 + $0x28] ss:$16 sps:$4 sm:$0xff] (!%p2083_p7)  }
  0x1a   : > { %702 = vmatprep.subr.bf16.mxu0 (!%p2083_p7), %v2257_v5  ;;  %775 = vmatprep.subr.bf16.mxu1 (!%p2083_p7), %v2259_v6  ;;  %v2263_v9 = vld [vmem:[%s3495_s1 + $0x44] ss:$16 sps:$4 sm:$0xff] (!%p2083_p7)   ;;  %v2265_v10 = vld [vmem:[%s3495_s1 + $0x4c] ss:$16 sps:$4 sm:$0xff] (!%p2083_p7)   ;;  %v2267_v11 = vld [vmem:[%s3495_s1 + $0x40] ss:$16 sps:$4 sm:$0xff] (!%p2083_p7)  }
  0x1b   : > { %v2268_v12 = vld [vmem:[%s3495_s1 + $0x48] ss:$16 sps:$4 sm:$0xff] (!%p2083_p7)   ;;  %v2269_v13 = vld [vmem:[%s3495_s1 + $0x64] ss:$16 sps:$4 sm:$0xff] (!%p2083_p7)   ;;  %v2271_v14 = vld [vmem:[%s3495_s1 + $0x6c] ss:$16 sps:$4 sm:$0xff] (!%p2083_p7)  }
  0x1c   : > { %v2273_v15 = vld [vmem:[%s3495_s1 + $0x60] ss:$16 sps:$4 sm:$0xff] (!%p2083_p7)   ;;  %v2274_v16 = vld [vmem:[%s3495_s1 + $0x68] ss:$16 sps:$4 sm:$0xff] (!%p2083_p7)   ;;  %v2275_v17 = vld [vmem:[%s3495_s1 + $0x84] ss:$16 sps:$4 sm:$0xff] (!%p2083_p7)  }
  0x1d   : > { %703 = vmatpush1.bf16.msra.mxu0 (!%p2083_p7), %v2261_v7  ;;  %776 = vmatpush1.bf16.msra.mxu1 (!%p2083_p7), %v2262_v8  ;;  %v2277_v18 = vld [vmem:[%s3495_s1 + $0x8c] ss:$16 sps:$4 sm:$0xff] (!%p2083_p7)   ;;  %v2279_v19 = vld [vmem:[%s3495_s1 + $0x80] ss:$16 sps:$4 sm:$0xff] (!%p2083_p7)   ;;  %v2280_v20 = vld [vmem:[%s3495_s1 + $0x88] ss:$16 sps:$4 sm:$0xff] (!%p2083_p7)  }
  0x1e   : > { %704 = vmatprep.subr.bf16.mxu0 (!%p2083_p7), %v2263_v9  ;;  %777 = vmatprep.subr.bf16.mxu1 (!%p2083_p7), %v2265_v10  ;;  %v2281_v21 = vld [vmem:[%s3495_s1 + $0xa4] ss:$16 sps:$4 sm:$0xff] (!%p2083_p7)   ;;  %v2283_v22 = vld [vmem:[%s3495_s1 + $0xac] ss:$16 sps:$4 sm:$0xff] (!%p2083_p7)   ;;  %v2285_v23 = vld [vmem:[%s3495_s1 + $0xa0] ss:$16 sps:$4 sm:$0xff] (!%p2083_p7)   ;;  %v320_v9 = vlaneseq (!%p2083_p7) }
  0x1f   : > { %v2286_v24 = vld [vmem:[%s3495_s1 + $0xa8] ss:$16 sps:$4 sm:$0xff]   ;;  %v2287_v25 = vld [vmem:[%s3495_s1 + $0xc4] ss:$16 sps:$4 sm:$0xff]   ;;  %v2289_v26 = vld [vmem:[%s3495_s1 + $0xcc] ss:$16 sps:$4 sm:$0xff]  }
  0x20   : > { %v2291_v27 = vld [vmem:[%s3495_s1 + $0xc0] ss:$16 sps:$4 sm:$0xff]   ;;  %v2292_v28 = vld [vmem:[%s3495_s1 + $0xc8] ss:$16 sps:$4 sm:$0xff]   ;;  %v2293_v29 = vld [vmem:[%s3495_s1 + $0xe4] ss:$16 sps:$4 sm:$0xff]  }
  0x21   : > { %705 = vmatpush1.bf16.msra.mxu0 %v2267_v11  ;;  %778 = vmatpush1.bf16.msra.mxu1 %v2268_v12  ;;  %v2295_v30 = vld [vmem:[%s3495_s1 + $0xec] ss:$16 sps:$4 sm:$0xff]   ;;  %v2297_v31 = vld [vmem:[%s3495_s1 + $0xe0] ss:$16 sps:$4 sm:$0xff]   ;;  %v2298_v32 = vld [vmem:[%s3495_s1 + $0xe8] ss:$16 sps:$4 sm:$0xff]  }
  0x22   : > { %706 = vmatprep.subr.bf16.mxu0 %v2269_v13  ;;  %779 = vmatprep.subr.bf16.mxu1 %v2271_v14  ;;  %v2299_v33 = vld [vmem:[%s3495_s1 + $0x104] ss:$16 sps:$4 sm:$0xff]   ;;  %v2301_v34 = vld [vmem:[%s3495_s1 + $0x10c] ss:$16 sps:$4 sm:$0xff]   ;;  %v2303_v35 = vld [vmem:[%s3495_s1 + $0x100] ss:$16 sps:$4 sm:$0xff]  }
  0x23   : > { %v2304_v36 = vld [vmem:[%s3495_s1 + $0x108] ss:$16 sps:$4 sm:$0xff]   ;;  %v2305_v37 = vld [vmem:[%s3495_s1 + $0x124] ss:$16 sps:$4 sm:$0xff]   ;;  %v2307_v38 = vld [vmem:[%s3495_s1 + $0x12c] ss:$16 sps:$4 sm:$0xff]  }
  0x24   : > { %v2309_v39 = vld [vmem:[%s3495_s1 + $0x120] ss:$16 sps:$4 sm:$0xff]   ;;  %v2310_v40 = vld [vmem:[%s3495_s1 + $0x128] ss:$16 sps:$4 sm:$0xff]   ;;  %v2311_v41 = vld [vmem:[%s3495_s1 + $0x144] ss:$16 sps:$4 sm:$0xff]  }
  0x25   : > { %707 = vmatpush1.bf16.msra.mxu0 %v2273_v15  ;;  %780 = vmatpush1.bf16.msra.mxu1 %v2274_v16  ;;  %v2313_v42 = vld [vmem:[%s3495_s1 + $0x14c] ss:$16 sps:$4 sm:$0xff]   ;;  %v2315_v43 = vld [vmem:[%s3495_s1 + $0x140] ss:$16 sps:$4 sm:$0xff]   ;;  %v2316_v44 = vld [vmem:[%s3495_s1 + $0x148] ss:$16 sps:$4 sm:$0xff]  }
  0x26   : > { %708 = vmatprep.subr.bf16.mxu0 %v2275_v17  ;;  %781 = vmatprep.subr.bf16.mxu1 %v2277_v18  ;;  %v2317_v45 = vld [vmem:[%s3495_s1 + $0x164] ss:$16 sps:$4 sm:$0xff]   ;;  %v2319_v46 = vld [vmem:[%s3495_s1 + $0x16c] ss:$16 sps:$4 sm:$0xff]   ;;  %v2321_v47 = vld [vmem:[%s3495_s1 + $0x160] ss:$16 sps:$4 sm:$0xff]  }
  0x27   : > { %v2322_v48 = vld [vmem:[%s3495_s1 + $0x168] ss:$16 sps:$4 sm:$0xff]   ;;  %v2349_v49 = vld [vmem:[%s2643_s24 + $0x4] ss:$8 sps:$4 sm:$0xff]   ;;  %v2327_v52 = vld [vmem:[%s3495_s1 + $0x180] ss:$16 sps:$4 sm:$0xff]  }
  0x28   : > { %v2323_v50 = vld [vmem:[%s3495_s1 + $0x184] ss:$16 sps:$4 sm:$0xff]   ;;  %v2325_v51 = vld [vmem:[%s3495_s1 + $0x18c] ss:$16 sps:$4 sm:$0xff]   ;;  %732 = vmatprep.mubr.bf16.mxu0 %v2349_v49  ;;  %805 = vmatprep.mubr.bf16.mxu1 %v2349_v49  ;;  %v2328_v53 = vld [vmem:[%s3495_s1 + $0x188] ss:$16 sps:$4 sm:$0xff]  }
  0x29   : > { %709 = vmatpush1.bf16.msra.mxu0 %v2279_v19  ;;  %782 = vmatpush1.bf16.msra.mxu1 %v2280_v20  ;;  %v2329_v54 = vld [vmem:[%s3495_s1 + $0x1a4] ss:$16 sps:$4 sm:$0xff]   ;;  %v2331_v55 = vld [vmem:[%s3495_s1 + $0x1ac] ss:$16 sps:$4 sm:$0xff]   ;;  %v2333_v56 = vld [vmem:[%s3495_s1 + $0x1a0] ss:$16 sps:$4 sm:$0xff]  }
  0x2a   : > { %710 = vmatprep.subr.bf16.mxu0 %v2281_v21  ;;  %783 = vmatprep.subr.bf16.mxu1 %v2283_v22  ;;  %v2334_v57 = vld [vmem:[%s3495_s1 + $0x1a8] ss:$16 sps:$4 sm:$0xff]   ;;  %v2335_v58 = vld [vmem:[%s3495_s1 + $0x1c4] ss:$16 sps:$4 sm:$0xff]   ;;  %v2337_v59 = vld [vmem:[%s3495_s1 + $0x1cc] ss:$16 sps:$4 sm:$0xff]  }
  0x2b   : > { %v2339_v60 = vld [vmem:[%s3495_s1 + $0x1c0] ss:$16 sps:$4 sm:$0xff]   ;;  %v2340_v61 = vld [vmem:[%s3495_s1 + $0x1c8] ss:$16 sps:$4 sm:$0xff]   ;;  %v2341_v62 = vld [vmem:[%s3495_s1 + $0x1e4] ss:$16 sps:$4 sm:$0xff]  }
  0x2c   : > { %v2343_v63 = vld [vmem:[%s3495_s1 + $0x1ec] ss:$16 sps:$4 sm:$0xff]   ;;  %v2345_v0 = vld [vmem:[%s3495_s1 + $0x1e0] ss:$16 sps:$4 sm:$0xff]   ;;  %v2346_v1 = vld [vmem:[%s3495_s1 + $0x1e8] ss:$16 sps:$4 sm:$0xff]  }
  0x2d   : > { %711 = vmatpush1.bf16.msra.mxu0 %v2285_v23  ;;  %784 = vmatpush1.bf16.msra.mxu1 %v2286_v24  ;;  %v2347_v2 = vld [vmem:[%s2643_s24] ss:$8 sps:$4 sm:$0xff]   ;;  %v2350_v3 = vld [vmem:[%s2643_s24 + $0x14] ss:$8 sps:$4 sm:$0xff]   ;;  %v2352_v4 = vld [vmem:[%s2643_s24 + $0x10] ss:$8 sps:$4 sm:$0xff]  }
  0x2e   : > { %712 = vmatprep.subr.bf16.mxu0 %v2287_v25  ;;  %785 = vmatprep.subr.bf16.mxu1 %v2289_v26  ;;  %v2353_v5 = vld [vmem:[%s2643_s24 + $0x24] ss:$8 sps:$4 sm:$0xff]   ;;  %v2355_v6 = vld [vmem:[%s2643_s24 + $0x20] ss:$8 sps:$4 sm:$0xff]   ;;  %v2356_v7 = vld [vmem:[%s2643_s24 + $0x34] ss:$8 sps:$4 sm:$0xff]  }
  0x2f   : > { %v2358_v8 = vld [vmem:[%s2643_s24 + $0x30] ss:$8 sps:$4 sm:$0xff]   ;;  %v321_v10 = vshrl.u32 %v320_v9, 7  ;;  %v318_v13 = vld [vmem:[%s3497_s3] sm:$0xf]  ;;  %s2223_s30 = sshll.u32 %s245_s27, 8 }
  0x30   : > { %s2863_s24 = scalar_lea.vmem [#allocation2], %s2223_s30 }
  0x31   : > { %713 = vmatpush1.bf16.msra.mxu0 %v2291_v27  ;;  %786 = vmatpush1.bf16.msra.mxu1 %v2292_v28  ;;  %v322_v11 = vsub.s32 0, %v321_v10  ;;  %v330_v12 = vsub.s32 2, %v321_v10  ;;  %v326_v14 = vsub.s32 1, %v321_v10  ;;  %v334_v15 = vsub.s32 3, %v321_v10 }
  0x32   : > { %714 = vmatprep.subr.bf16.mxu0 %v2293_v29  ;;  %787 = vmatprep.subr.bf16.mxu1 %v2295_v30 }
  0x33   : > { %v2851_v16 = vrot.slane %v318_v13, %v322_v11  ;;  %v2853_v17 = vrot.slane %v318_v13, %v330_v12  ;;  %v2855_v18 = vrot.slane %v318_v13, %v326_v14  ;;  %v2857_v19 = vrot.slane %v318_v13, %v334_v15 }
  0x35   : > { %715 = vmatpush1.bf16.msra.mxu0 %v2297_v31  ;;  %788 = vmatpush1.bf16.msra.mxu1 %v2298_v32 }
  0x36   : > { %716 = vmatprep.subr.bf16.mxu0 %v2299_v33  ;;  %789 = vmatprep.subr.bf16.mxu1 %v2301_v34 }
  0x39   : > { %717 = vmatpush1.bf16.msra.mxu0 %v2303_v35  ;;  %790 = vmatpush1.bf16.msra.mxu1 %v2304_v36 }
  0x3a   : > { %718 = vmatprep.subr.bf16.mxu0 %v2305_v37  ;;  %791 = vmatprep.subr.bf16.mxu1 %v2307_v38 }
  0x3d   : > { %719 = vmatpush1.bf16.msra.mxu0 %v2309_v39  ;;  %792 = vmatpush1.bf16.msra.mxu1 %v2310_v40 }
  0x3e   : > { %720 = vmatprep.subr.bf16.mxu0 %v2311_v41  ;;  %793 = vmatprep.subr.bf16.mxu1 %v2313_v42 }
  0x41   : > { %721 = vmatpush1.bf16.msra.mxu0 %v2315_v43  ;;  %794 = vmatpush1.bf16.msra.mxu1 %v2316_v44 }
  0x42   : > { %722 = vmatprep.subr.bf16.mxu0 %v2317_v45  ;;  %795 = vmatprep.subr.bf16.mxu1 %v2319_v46 }
  0x45   : > { %723 = vmatpush1.bf16.msra.mxu0 %v2321_v47  ;;  %796 = vmatpush1.bf16.msra.mxu1 %v2322_v48 }
  0x46   : > { %724 = vmatprep.subr.bf16.mxu0 %v2323_v50  ;;  %797 = vmatprep.subr.bf16.mxu1 %v2325_v51 }
  0x49   : > { %725 = vmatpush1.bf16.msra.mxu0 %v2327_v52  ;;  %798 = vmatpush1.bf16.msra.mxu1 %v2328_v53 }
  0x4a   : > { %726 = vmatprep.subr.bf16.mxu0 %v2329_v54  ;;  %799 = vmatprep.subr.bf16.mxu1 %v2331_v55 }
  0x4d   : > { %727 = vmatpush1.bf16.msra.mxu0 %v2333_v56  ;;  %800 = vmatpush1.bf16.msra.mxu1 %v2334_v57 }
  0x4e   : > { %728 = vmatprep.subr.bf16.mxu0 %v2335_v58  ;;  %801 = vmatprep.subr.bf16.mxu1 %v2337_v59 }
  0x51   : > { %729 = vmatpush1.bf16.msra.mxu0 %v2339_v60  ;;  %802 = vmatpush1.bf16.msra.mxu1 %v2340_v61 }
  0x52   : > { %730 = vmatprep.subr.bf16.mxu0 %v2341_v62  ;;  %803 = vmatprep.subr.bf16.mxu1 %v2343_v63 }
  0x55   : > { %731 = vmatpush1.bf16.msra.mxu0 %v2345_v0  ;;  %804 = vmatpush1.bf16.msra.mxu1 %v2346_v1 }
  0x58   : > { %733 = vmatmul.mubr.bf16.vlgmr.msra.gmra.mrb[0].mxu0 %v2347_v2  ;;  %806 = vmatmul.mubr.bf16.vlgmr.msra.gmra.mrb[0].mxu1 %v2347_v2 }
  0x59   : > { %742 = vmatprep.mubr.bf16.mxu0 %v2350_v3  ;;  %815 = vmatprep.mubr.bf16.mxu1 %v2350_v3 }
  0x60   : > { %743 = vmatmul.mubr.bf16.gmra.mrb[4].mxu0 %v2352_v4  ;;  %816 = vmatmul.mubr.bf16.gmra.mrb[4].mxu1 %v2352_v4 }
  0x61   : > { %752 = vmatprep.mubr.bf16.mxu0 %v2353_v5  ;;  %825 = vmatprep.mubr.bf16.mxu1 %v2353_v5 }
  0x68   : > { %753 = vmatmul.mubr.bf16.gmra.mrb[8].mxu0 %v2355_v6  ;;  %826 = vmatmul.mubr.bf16.gmra.mrb[8].mxu1 %v2355_v6 }
  0x69   : > { %762 = vmatprep.mubr.bf16.mxu0 %v2356_v7  ;;  %835 = vmatprep.mubr.bf16.mxu1 %v2356_v7 }
  0x70   : > { %763 = vmatmul.mubr.bf16.gmra.mrb[12].mxu0 %v2358_v8  ;;  %836 = vmatmul.mubr.bf16.gmra.mrb[12].mxu1 %v2358_v8 }
 0x12b   : > { %v734_v20 = vpop.f32.mrb[0].mxu0  ;;  %v807_v21 = vpop.f32.mrb[0].mxu1 }
 0x12c   : > { %v735_v22 = vadd.f32 %v734_v20, %v2851_v16  ;;  %v808_v23 = vadd.f32 %v807_v21, %v2853_v17  ;;  %v736_v24 = vpop.f32.mrb[1].mxu0  ;;  %v809_v25 = vpop.f32.mrb[1].mxu1 }
 0x12d   : > { %v737_v26 = vadd.f32 %v736_v24, %v2855_v18  ;;  %v810_v27 = vadd.f32 %v809_v25, %v2857_v19  ;;  %v738_v28 = vpop.f32.mrb[2].mxu0  ;;  %v811_v29 = vpop.f32.mrb[2].mxu1 }
 0x12e   : > { %849 = vst [vmem:[%s2863_s24] sm:$0xff] %v735_v22  ;;  %851 = vst [vmem:[%s2863_s24 + $0x10] sm:$0xff] %v808_v23  ;;  %v739_v30 = vadd.f32 %v738_v28, %v2851_v16  ;;  %v812_v31 = vadd.f32 %v811_v29, %v2853_v17  ;;  %v740_v32 = vpop.f32.mrb[3].mxu0  ;;  %v813_v33 = vpop.f32.mrb[3].mxu1 }
 0x12f   : > { %850 = vst [vmem:[%s2863_s24 + $0x8] sm:$0xff] %v737_v26  ;;  %852 = vst [vmem:[%s2863_s24 + $0x18] sm:$0xff] %v810_v27  ;;  %v741_v34 = vadd.f32 %v740_v32, %v2855_v18  ;;  %v814_v35 = vadd.f32 %v813_v33, %v2857_v19 }
 0x130   : > { %853 = vst [vmem:[%s2863_s24 + $0x20] sm:$0xff] %v739_v30  ;;  %855 = vst [vmem:[%s2863_s24 + $0x30] sm:$0xff] %v812_v31 }
 0x131   : > { %854 = vst [vmem:[%s2863_s24 + $0x28] sm:$0xff] %v741_v34  ;;  %856 = vst [vmem:[%s2863_s24 + $0x38] sm:$0xff] %v814_v35 }
 0x133   : > { %v744_v36 = vpop.f32.mrb[4].mxu0  ;;  %v817_v37 = vpop.f32.mrb[4].mxu1 }
 0x134   : > { %v745_v38 = vadd.f32 %v744_v36, %v2851_v16  ;;  %v818_v39 = vadd.f32 %v817_v37, %v2853_v17  ;;  %v746_v40 = vpop.f32.mrb[5].mxu0  ;;  %v819_v41 = vpop.f32.mrb[5].mxu1 }
 0x135   : > { %v747_v42 = vadd.f32 %v746_v40, %v2855_v18  ;;  %v820_v43 = vadd.f32 %v819_v41, %v2857_v19  ;;  %v748_v44 = vpop.f32.mrb[6].mxu0  ;;  %v821_v45 = vpop.f32.mrb[6].mxu1 }
 0x136   : > { %857 = vst [vmem:[%s2863_s24 + $0x40] sm:$0xff] %v745_v38  ;;  %859 = vst [vmem:[%s2863_s24 + $0x50] sm:$0xff] %v818_v39  ;;  %v749_v46 = vadd.f32 %v748_v44, %v2851_v16  ;;  %v822_v47 = vadd.f32 %v821_v45, %v2853_v17  ;;  %v750_v48 = vpop.f32.mrb[7].mxu0  ;;  %v823_v49 = vpop.f32.mrb[7].mxu1 }
 0x137   : > { %858 = vst [vmem:[%s2863_s24 + $0x48] sm:$0xff] %v747_v42  ;;  %860 = vst [vmem:[%s2863_s24 + $0x58] sm:$0xff] %v820_v43  ;;  %v751_v50 = vadd.f32 %v750_v48, %v2855_v18  ;;  %v824_v51 = vadd.f32 %v823_v49, %v2857_v19 }
 0x138   : > { %861 = vst [vmem:[%s2863_s24 + $0x60] sm:$0xff] %v749_v46  ;;  %863 = vst [vmem:[%s2863_s24 + $0x70] sm:$0xff] %v822_v47 }
 0x139   : > { %862 = vst [vmem:[%s2863_s24 + $0x68] sm:$0xff] %v751_v50  ;;  %864 = vst [vmem:[%s2863_s24 + $0x78] sm:$0xff] %v824_v51 }
 0x13b   : > { %v754_v52 = vpop.f32.mrb[8].mxu0  ;;  %v827_v53 = vpop.f32.mrb[8].mxu1 }
 0x13c   : > { %v755_v54 = vadd.f32 %v754_v52, %v2851_v16  ;;  %v828_v55 = vadd.f32 %v827_v53, %v2853_v17  ;;  %v756_v56 = vpop.f32.mrb[9].mxu0  ;;  %v829_v57 = vpop.f32.mrb[9].mxu1 }
 0x13d   : > { %v757_v58 = vadd.f32 %v756_v56, %v2855_v18  ;;  %v830_v59 = vadd.f32 %v829_v57, %v2857_v19  ;;  %v758_v60 = vpop.f32.mrb[10].mxu0  ;;  %v831_v61 = vpop.f32.mrb[10].mxu1 }
 0x13e   : > { %865 = vst [vmem:[%s2863_s24 + $0x80] sm:$0xff] %v755_v54  ;;  %867 = vst [vmem:[%s2863_s24 + $0x90] sm:$0xff] %v828_v55  ;;  %v759_v62 = vadd.f32 %v758_v60, %v2851_v16  ;;  %v832_v63 = vadd.f32 %v831_v61, %v2853_v17  ;;  %v760_v0 = vpop.f32.mrb[11].mxu0  ;;  %v833_v1 = vpop.f32.mrb[11].mxu1 }
 0x13f   : > { %866 = vst [vmem:[%s2863_s24 + $0x88] sm:$0xff] %v757_v58  ;;  %868 = vst [vmem:[%s2863_s24 + $0x98] sm:$0xff] %v830_v59  ;;  %v761_v2 = vadd.f32 %v760_v0, %v2855_v18  ;;  %v834_v3 = vadd.f32 %v833_v1, %v2857_v19 }
 0x140   : > { %869 = vst [vmem:[%s2863_s24 + $0xa0] sm:$0xff] %v759_v62  ;;  %871 = vst [vmem:[%s2863_s24 + $0xb0] sm:$0xff] %v832_v63 }
 0x141   : > { %870 = vst [vmem:[%s2863_s24 + $0xa8] sm:$0xff] %v761_v2  ;;  %872 = vst [vmem:[%s2863_s24 + $0xb8] sm:$0xff] %v834_v3 }
 0x143   : > { %v764_v4 = vpop.f32.mrb[12].mxu0  ;;  %v837_v5 = vpop.f32.mrb[12].mxu1 }
 0x144   : > { %v765_v6 = vadd.f32 %v764_v4, %v2851_v16  ;;  %v838_v7 = vadd.f32 %v837_v5, %v2853_v17  ;;  %v766_v8 = vpop.f32.mrb[13].mxu0  ;;  %v839_v9 = vpop.f32.mrb[13].mxu1 }
 0x145   : > { %v767_v10 = vadd.f32 %v766_v8, %v2855_v18  ;;  %v840_v11 = vadd.f32 %v839_v9, %v2857_v19  ;;  %v768_v12 = vpop.f32.mrb[14].mxu0  ;;  %v841_v13 = vpop.f32.mrb[14].mxu1 }
 0x146   : > { %873 = vst [vmem:[%s2863_s24 + $0xc0] sm:$0xff] %v765_v6  ;;  %875 = vst [vmem:[%s2863_s24 + $0xd0] sm:$0xff] %v838_v7  ;;  %v769_v14 = vadd.f32 %v768_v12, %v2851_v16  ;;  %v842_v15 = vadd.f32 %v841_v13, %v2853_v17  ;;  %v770_v20 = vpop.f32.mrb[15].mxu0  ;;  %v843_v21 = vpop.f32.mrb[15].mxu1 }
 0x147   : > { %874 = vst [vmem:[%s2863_s24 + $0xc8] sm:$0xff] %v767_v10  ;;  %876 = vst [vmem:[%s2863_s24 + $0xd8] sm:$0xff] %v840_v11  ;;  %v771_v22 = vadd.f32 %v770_v20, %v2855_v18  ;;  %v844_v23 = vadd.f32 %v843_v21, %v2857_v19 }
 0x148   : > { %877 = vst [vmem:[%s2863_s24 + $0xe0] sm:$0xff] %v769_v14  ;;  %879 = vst [vmem:[%s2863_s24 + $0xf0] sm:$0xff] %v842_v15 }
 0x149   : > { %878 = vst [vmem:[%s2863_s24 + $0xe8] sm:$0xff] %v771_v22  ;;  %880 = vst [vmem:[%s2863_s24 + $0xf8] sm:$0xff] %v844_v23 }
 0x14a PF: > { %p2158_p8 = scmp.le.s32.totalorder %s2581_s15, 0 }
 0x14b   : > { %v2929_v16 = vld [vmem:[%s3496_s2 + $0x4] ss:$16 sps:$4 sm:$0xff] (!%p2158_p8)   ;;  %v2934_v17 = vld [vmem:[%s3496_s2] ss:$16 sps:$4 sm:$0xff] (!%p2158_p8)   ;;  %v2592_v18 = vmov (!%p2158_p8), 0   ;;  %s2159_s30 = sadd.s32 (!%p2158_p8), 4294967295, %s2581_s15 }
 0x14c   : > { %884 = sbr.rel (%p2158_p8) target bundleno = 2444 (0x98c), region = 48  ;;  %1121 = vmatprep.mubr.bf16.mxu0 (!%p2158_p8), %v2592_v18  ;;  %1162 = vmatprep.mubr.bf16.mxu1 (!%p2158_p8), %v2592_v18  ;;  %v2942_v19 = vld [vmem:[%s3496_s2 + $0x24] ss:$16 sps:$4 sm:$0xff] (!%p2158_p8)   ;;  %v2948_v24 = vld [vmem:[%s3496_s2 + $0x20] ss:$16 sps:$4 sm:$0xff] (!%p2158_p8)   ;;  %s886_s24 = sand.u32 (!%p2158_p8), 1, %s2159_s30 }
 0x14d   : > { %1089 = vmatprep.subr.bf16.mxu0 (!%p2158_p8), %v2929_v16  ;;  %v2954_v25 = vld [vmem:[%s3496_s2 + $0x44] ss:$16 sps:$4 sm:$0xff] (!%p2158_p8)   ;;  %v2959_v26 = vld [vmem:[%s3496_s2 + $0xc] ss:$16 sps:$4 sm:$0xff] (!%p2158_p8)   ;;  %v2964_v27 = vld [vmem:[%s3496_s2 + $0x8] ss:$16 sps:$4 sm:$0xff] (!%p2158_p8)  }
 0x14e   : > { %1090 = vmatpush1.bf16.msra.mxu0 (!%p2158_p8), %v2934_v17  ;;  %v2970_v28 = vld [vmem:[%s3496_s2 + $0x40] ss:$16 sps:$4 sm:$0xff] (!%p2158_p8)   ;;  %1130 = vmatprep.subr.bf16.mxu1 (!%p2158_p8), %v2959_v26  ;;  %v2977_v29 = vld [vmem:[%s3496_s2 + $0x64] ss:$16 sps:$4 sm:$0xff] (!%p2158_p8)   ;;  %v2983_v30 = vld [vmem:[%s3496_s2 + $0x2c] ss:$16 sps:$4 sm:$0xff] (!%p2158_p8)  }
 0x14f   : > { %1091 = vmatprep.subr.bf16.mxu0 (!%p2158_p8), %v2942_v19  ;;  %1131 = vmatpush1.bf16.msra.mxu1 (!%p2158_p8), %v2964_v27  ;;  %v2988_v31 = vld [vmem:[%s3496_s2 + $0x28] ss:$16 sps:$4 sm:$0xff] (!%p2158_p8)   ;;  %v2995_v32 = vld [vmem:[%s3496_s2 + $0x60] ss:$16 sps:$4 sm:$0xff] (!%p2158_p8)   ;;  %v3000_v33 = vld [vmem:[%s3496_s2 + $0x84] ss:$16 sps:$4 sm:$0xff] (!%p2158_p8)  }
 0x150   : > { %1132 = vmatprep.subr.bf16.mxu1 (!%p2158_p8), %v2983_v30  ;;  %v3005_v34 = vld [vmem:[%s3496_s2 + $0x4c] ss:$16 sps:$4 sm:$0xff] (!%p2158_p8)   ;;  %v3012_v35 = vld [vmem:[%s3496_s2 + $0x48] ss:$16 sps:$4 sm:$0xff] (!%p2158_p8)   ;;  %v3024_v37 = vld [vmem:[%s3496_s2 + $0x80] ss:$16 sps:$4 sm:$0xff] (!%p2158_p8)  }
 0x151   : > { %v3018_v36 = vld [vmem:[%s3496_s2 + $0x6c] ss:$16 sps:$4 sm:$0xff] (!%p2158_p8)   ;;  %v3030_v38 = vld [vmem:[%s3496_s2 + $0xa4] ss:$16 sps:$4 sm:$0xff] (!%p2158_p8)   ;;  %v3036_v39 = vld [vmem:[%s3496_s2 + $0x68] ss:$16 sps:$4 sm:$0xff] (!%p2158_p8)  }
 0x152   : > { %1092 = vmatpush1.bf16.msra.mxu0 (!%p2158_p8), %v2948_v24  ;;  %v3042_v40 = vld [vmem:[%s3496_s2 + $0x8c] ss:$16 sps:$4 sm:$0xff] (!%p2158_p8)   ;;  %v3047_v41 = vld [vmem:[%s3496_s2 + $0xa0] ss:$16 sps:$4 sm:$0xff] (!%p2158_p8)   ;;  %v3053_v42 = vld [vmem:[%s3496_s2 + $0xc4] ss:$16 sps:$4 sm:$0xff] (!%p2158_p8)  }
 0x153   : > { %1093 = vmatprep.subr.bf16.mxu0 %v2954_v25  ;;  %1133 = vmatpush1.bf16.msra.mxu1 %v2988_v31  ;;  %v3060_v43 = vld [vmem:[%s3496_s2 + $0x88] ss:$16 sps:$4 sm:$0xff]   ;;  %v3066_v44 = vld [vmem:[%s3496_s2 + $0xac] ss:$16 sps:$4 sm:$0xff]   ;;  %v3072_v45 = vld [vmem:[%s3496_s2 + $0xc0] ss:$16 sps:$4 sm:$0xff]  }
 0x154   : > { %1134 = vmatprep.subr.bf16.mxu1 %v3005_v34  ;;  %v3078_v46 = vld [vmem:[%s3496_s2 + $0xe4] ss:$16 sps:$4 sm:$0xff]   ;;  %v3084_v47 = vld [vmem:[%s3496_s2 + $0xa8] ss:$16 sps:$4 sm:$0xff]   ;;  %v3090_v48 = vld [vmem:[%s3496_s2 + $0xcc] ss:$16 sps:$4 sm:$0xff]  }
 0x155   : > { %v3096_v49 = vld [vmem:[%s3496_s2 + $0xe0] ss:$16 sps:$4 sm:$0xff]   ;;  %v3103_v51 = vld [vmem:[%s3496_s2 + $0xc8] ss:$16 sps:$4 sm:$0xff]   ;;  %v3109_v52 = vld [vmem:[%s3496_s2 + $0xec] ss:$16 sps:$4 sm:$0xff]  }
 0x156   : > { %1094 = vmatpush1.bf16.msra.mxu0 %v2970_v28  ;;  %v919_v50 = vld [vmem:[#allocation3] sm:$0xff]  ;;  %v3116_v54 = vld [vmem:[%s3496_s2 + $0xe8] ss:$16 sps:$4 sm:$0xff]   ;;  %s2224_s5 = sshll.u32 %s886_s24, 8 }
 0x157   : > { %1095 = vmatprep.subr.bf16.mxu0 %v2977_v29  ;;  %1135 = vmatpush1.bf16.msra.mxu1 %v3012_v35  ;;  %v928_v53 = vpack.c.bf16 %v919_v50, %v919_v50  ;;  %s3157_s6 = scalar_lea.vmem [#allocation2], %s2224_s5  ;;  %v920_v20 = vld [vmem:[#allocation4] sm:$0xff] }
 0x158   : > { %1136 = vmatprep.subr.bf16.mxu1 %v3018_v36  ;;  %v924_v55 = vld [vmem:[%s3157_s6] sm:$0xff]  ;;  %v925_v56 = vld [vmem:[%s3157_s6 + $0x8] sm:$0xff]  ;;  %v926_v1 = vld [vmem:[%s3157_s6 + $0x10] sm:$0xff] }
 0x159   : > { %v927_v7 = vld [vmem:[%s3157_s6 + $0x18] sm:$0xff] }
 0x15a   : > { %1096 = vmatpush1.bf16.msra.mxu0 %v2995_v32 }
 0x15b   : > { %1097 = vmatprep.subr.bf16.mxu0 %v3000_v33  ;;  %1137 = vmatpush1.bf16.msra.mxu1 %v3036_v39 }
 0x15c   : > { %1138 = vmatprep.subr.bf16.mxu1 %v3042_v40 }
 0x15e   : > { %1098 = vmatpush1.bf16.msra.mxu0 %v3024_v37 }
 0x15f   : > { %1099 = vmatprep.subr.bf16.mxu0 %v3030_v38  ;;  %1139 = vmatpush1.bf16.msra.mxu1 %v3060_v43 }
 0x160   : > { %1140 = vmatprep.subr.bf16.mxu1 %v3066_v44 }
 0x162   : > { %1100 = vmatpush1.bf16.msra.mxu0 %v3047_v41 }
 0x163   : > { %1101 = vmatprep.subr.bf16.mxu0 %v3053_v42  ;;  %1141 = vmatpush1.bf16.msra.mxu1 %v3084_v47 }
 0x164   : > { %1142 = vmatprep.subr.bf16.mxu1 %v3090_v48 }
 0x166   : > { %1102 = vmatpush1.bf16.msra.mxu0 %v3072_v45 }
 0x167   : > { %1103 = vmatprep.subr.bf16.mxu0 %v3078_v46  ;;  %1143 = vmatpush1.bf16.msra.mxu1 %v3103_v51 }
 0x168   : > { %1144 = vmatprep.subr.bf16.mxu1 %v3109_v52 }
 0x16a   : > { %1104 = vmatpush1.bf16.msra.mxu0 %v3096_v49 }
 0x16b   : > { %1204 = vmatprep.subr.bf16.mxu0 %v2929_v16  ;;  %1145 = vmatpush1.bf16.msra.mxu1 %v3116_v54 }
 0x16c   : > { %1245 = vmatprep.subr.bf16.mxu1 %v2959_v26 }
 0x16d   : > { %1122 = vmatmul.mubr.bf16.vlgmr.msra.gmra.mrb[0].mxu0 %v928_v53 }
 0x16e   : > { %1205 = vmatpush1.bf16.msra.mxu0 %v2934_v17  ;;  %1236 = vmatprep.mubr.bf16.mxu0 %v2592_v18 }
 0x16f   : > { %1206 = vmatprep.subr.bf16.mxu0 %v2942_v19  ;;  %1163 = vmatmul.mubr.bf16.vlgmr.msra.gmra.mrb[0].mxu1 %v928_v53 }
 0x170   : > { %1246 = vmatpush1.bf16.msra.mxu1 %v2964_v27  ;;  %1277 = vmatprep.mubr.bf16.mxu1 %v2592_v18 }
 0x171   : > { %1247 = vmatprep.subr.bf16.mxu1 %v2983_v30 }
 0x172   : > { %1207 = vmatpush1.bf16.msra.mxu0 %v2948_v24 }
 0x173   : > { %1208 = vmatprep.subr.bf16.mxu0 %v2954_v25 }
 0x174   : > { %1248 = vmatpush1.bf16.msra.mxu1 %v2988_v31 }
 0x175   : > { %1249 = vmatprep.subr.bf16.mxu1 %v3005_v34 }
 0x176   : > { %1209 = vmatpush1.bf16.msra.mxu0 %v2970_v28 }
 0x177   : > { %1210 = vmatprep.subr.bf16.mxu0 %v2977_v29 }
 0x178   : > { %1250 = vmatpush1.bf16.msra.mxu1 %v3012_v35 }
 0x179   : > { %1251 = vmatprep.subr.bf16.mxu1 %v3018_v36 }
 0x17a   : > { %1211 = vmatpush1.bf16.msra.mxu0 %v2995_v32 }
 0x17b   : > { %1212 = vmatprep.subr.bf16.mxu0 %v3000_v33 }
 0x17c   : > { %1252 = vmatpush1.bf16.msra.mxu1 %v3036_v39 }
 0x17d   : > { %1253 = vmatprep.subr.bf16.mxu1 %v3042_v40 }
 0x17e   : > { %1213 = vmatpush1.bf16.msra.mxu0 %v3024_v37 }
 0x17f   : > { %1214 = vmatprep.subr.bf16.mxu0 %v3030_v38 }
 0x180   : > { %1254 = vmatpush1.bf16.msra.mxu1 %v3060_v43 }
 0x181   : > { %1255 = vmatprep.subr.bf16.mxu1 %v3066_v44 }
 0x182   : > { %1215 = vmatpush1.bf16.msra.mxu0 %v3047_v41 }
 0x183   : > { %1216 = vmatprep.subr.bf16.mxu0 %v3053_v42 }
 0x184   : > { %1256 = vmatpush1.bf16.msra.mxu1 %v3084_v47 }
 0x185   : > { %1257 = vmatprep.subr.bf16.mxu1 %v3090_v48 }
 0x186   : > { %1217 = vmatpush1.bf16.msra.mxu0 %v3072_v45 }
 0x187   : > { %1218 = vmatprep.subr.bf16.mxu0 %v3078_v46 }
 0x188   : > { %1258 = vmatpush1.bf16.msra.mxu1 %v3103_v51 }
 0x189   : > { %1259 = vmatprep.subr.bf16.mxu1 %v3109_v52 }
 0x18a   : > { %1219 = vmatpush1.bf16.msra.mxu0 %v3096_v49 }
 0x18b   : > { %1319 = vmatprep.subr.bf16.mxu0 %v2929_v16 }
 0x18c   : > { %1260 = vmatpush1.bf16.msra.mxu1 %v3116_v54 }
 0x18d   : > { %1360 = vmatprep.subr.bf16.mxu1 %v2959_v26 }
 0x240   : > { %v1123_v57 = vpop.f32.mrb[0].mxu0 }
 0x241   : > { %v1171_v58 = vadd.f32 %v1123_v57, %v924_v55  ;;  %v1125_v59 = vpop.f32.mrb[1].mxu0 }
 0x242   : > { %v1172_v60 = vadd.f32 %v1125_v59, %v925_v56  ;;  %v1127_v61 = vpop.f32.mrb[2].mxu0  ;;  %v1164_v2 = vpop.f32.mrb[0].mxu1 }
 0x243   : > { %v2194_v62 = vmul.f32 -1.442695, %v1171_v58  ;;  %v1128_v63 = vpop.f32.mrb[3].mxu0  ;;  %v1166_v3 = vpop.f32.mrb[1].mxu1  ;;  %v1173_v4 = vadd.f32 %v1164_v2, %v926_v1  ;;  %v1200_v61 = vld [vmem:[%s3157_s6 + $0x28] sm:$0xff] }
 0x244   : > { %v2195_v0 = vmul.f32 -1.442695, %v1172_v60  ;;  %v1168_v5 = vpop.f32.mrb[2].mxu1  ;;  %v1174_v9 = vadd.f32 %v1166_v3, %v927_v7  ;;  %v1199_v60 = vld [vmem:[%s3157_s6 + $0x20] sm:$0xff] }
 0x245   : > { %2407 = vpow2.f32 %v2194_v62  ;;  %v1169_v6 = vpop.f32.mrb[3].mxu1  ;;  %v2196_v8 = vmul.f32 -1.442695, %v1173_v4 }
 0x246   : > { %2409 = vpow2.f32 %v2195_v0 }
 0x247   : > { %2411 = vpow2.f32 %v2196_v8 }
 0x248   : > { %2413 = vtanh.f32 %v1174_v9 }
 0x24f   : > { %v2408_v10 = vpop.eup %2407 }
 0x250   : > { %v2410_v11 = vpop.eup %2409  ;;  %v1184_v12 = vadd.f32 1.0, %v2408_v10  ;;  %v1201_v10 = vld [vmem:[%s3157_s6 + $0x30] sm:$0xff] }
 0x251   : > { %v1185_v13 = vadd.f32 1.0, %v2410_v11  ;;  %v2412_v14 = vpop.eup %2411 }
 0x252   : > { %2415 = vrcp.f32 %v1184_v12  ;;  %v2414_v15 = vpop.eup %2413  ;;  %v1186_v22 = vadd.f32 1.0, %v2412_v14  ;;  %v1202_v12 = vld [vmem:[%s3157_s6 + $0x38] sm:$0xff] }
 0x253   : > { %2417 = vrcp.f32 %v1185_v13 }
 0x254   : > { %2419 = vrcp.f32 %v1186_v22 }
 0x25c   : > { %v2416_v21 = vpop.eup %2415 }
 0x25d   : > { %v2418_v23 = vpop.eup %2417  ;;  %v1195_v50 = vmul.f32 %v2416_v21, %v2414_v15 }
 0x25e   : > { %v1194_v53 = vmul.f32 %v2418_v23, %v920_v20  ;;  %v2420_v56 = vpop.eup %2419 }
 0x260   : > { %v3163_v55 = vadd.f32 %v1195_v50, %v1194_v53 }
 0x262   : > { %2421 = vtanh.f32 %v3163_v55 }
 0x26c   : > { %v2422_v57 = vpop.eup %2421 }
 0x26d   : > { %v1198_v58 = vmul.f32 %v2422_v57, %v2420_v56 }
 0x26f   : > { %v1203_v59 = vpack.c.bf16 %v1198_v58, %v1198_v58 }
 0x271   : > { %1237 = vmatmul.mubr.bf16.vlgmr.msra.gmra.mrb[4].mxu0 %v1203_v59  ;;  %1278 = vmatmul.mubr.bf16.vlgmr.msra.gmra.mrb[4].mxu1 %v1203_v59 }
 0x272   : > { %1320 = vmatpush1.bf16.msra.mxu0 %v2934_v17  ;;  %1361 = vmatpush1.bf16.msra.mxu1 %v2964_v27 }
 0x273   : > { %1321 = vmatprep.subr.bf16.mxu0 %v2942_v19  ;;  %1362 = vmatprep.subr.bf16.mxu1 %v2983_v30 }
 0x274   : > { %1351 = vmatprep.mubr.bf16.mxu0 %v2592_v18  ;;  %1392 = vmatprep.mubr.bf16.mxu1 %v2592_v18 }
 0x276   : > { %1322 = vmatpush1.bf16.msra.mxu0 %v2948_v24  ;;  %1363 = vmatpush1.bf16.msra.mxu1 %v2988_v31 }
 0x277   : > { %1323 = vmatprep.subr.bf16.mxu0 %v2954_v25  ;;  %1364 = vmatprep.subr.bf16.mxu1 %v3005_v34 }
 0x27a   : > { %1324 = vmatpush1.bf16.msra.mxu0 %v2970_v28  ;;  %1365 = vmatpush1.bf16.msra.mxu1 %v3012_v35 }
 0x27b   : > { %1325 = vmatprep.subr.bf16.mxu0 %v2977_v29  ;;  %1366 = vmatprep.subr.bf16.mxu1 %v3018_v36 }
 0x27e   : > { %1326 = vmatpush1.bf16.msra.mxu0 %v2995_v32  ;;  %1367 = vmatpush1.bf16.msra.mxu1 %v3036_v39 }
 0x27f   : > { %1327 = vmatprep.subr.bf16.mxu0 %v3000_v33  ;;  %1368 = vmatprep.subr.bf16.mxu1 %v3042_v40 }
 0x282   : > { %1328 = vmatpush1.bf16.msra.mxu0 %v3024_v37  ;;  %1369 = vmatpush1.bf16.msra.mxu1 %v3060_v43 }
 0x283   : > { %1329 = vmatprep.subr.bf16.mxu0 %v3030_v38  ;;  %1370 = vmatprep.subr.bf16.mxu1 %v3066_v44 }
 0x286   : > { %1330 = vmatpush1.bf16.msra.mxu0 %v3047_v41  ;;  %1371 = vmatpush1.bf16.msra.mxu1 %v3084_v47 }
 0x287   : > { %1331 = vmatprep.subr.bf16.mxu0 %v3053_v42  ;;  %1372 = vmatprep.subr.bf16.mxu1 %v3090_v48 }
 0x28a   : > { %1332 = vmatpush1.bf16.msra.mxu0 %v3072_v45  ;;  %1373 = vmatpush1.bf16.msra.mxu1 %v3103_v51 }
 0x28b   : > { %1333 = vmatprep.subr.bf16.mxu0 %v3078_v46  ;;  %1374 = vmatprep.subr.bf16.mxu1 %v3109_v52 }
 0x28e   : > { %1334 = vmatpush1.bf16.msra.mxu0 %v3096_v49  ;;  %1375 = vmatpush1.bf16.msra.mxu1 %v3116_v54 }
 0x28f   : > { %1434 = vmatprep.subr.bf16.mxu0 %v2929_v16  ;;  %1475 = vmatprep.subr.bf16.mxu1 %v2959_v26 }
 0x344   : > { %v1238_v62 = vpop.f32.mrb[4].mxu0  ;;  %v1279_v63 = vpop.f32.mrb[4].mxu1 }
 0x345   : > { %v1286_v0 = vadd.f32 %v1238_v62, %v1199_v60  ;;  %v1240_v1 = vpop.f32.mrb[5].mxu0  ;;  %v1281_v2 = vpop.f32.mrb[5].mxu1  ;;  %v1288_v11 = vadd.f32 %v1279_v63, %v1201_v10 }
 0x346   : > { %v1287_v3 = vadd.f32 %v1240_v1, %v1200_v61  ;;  %v1242_v4 = vpop.f32.mrb[6].mxu0  ;;  %v1283_v5 = vpop.f32.mrb[6].mxu1  ;;  %v1289_v13 = vadd.f32 %v1281_v2, %v1202_v12  ;;  %v1315_v1 = vld [vmem:[%s3157_s6 + $0x48] sm:$0xff] }
 0x347   : > { %v2197_v6 = vmul.f32 -1.442695, %v1286_v0  ;;  %v1243_v7 = vpop.f32.mrb[7].mxu0  ;;  %v1284_v8 = vpop.f32.mrb[7].mxu1  ;;  %v2199_v14 = vmul.f32 -1.442695, %v1288_v11 }
 0x348   : > { %v2198_v9 = vmul.f32 -1.442695, %v1287_v3 }
 0x349   : > { %2423 = vpow2.f32 %v2197_v6 }
 0x34a   : > { %2425 = vpow2.f32 %v2198_v9 }
 0x34b   : > { %2427 = vtanh.f32 %v1289_v13 }
 0x34c   : > { %2429 = vpow2.f32 %v2199_v14  ;;  %v1316_v14 = vld [vmem:[%s3157_s6 + $0x50] sm:$0xff] }
 0x353   : > { %v2424_v15 = vpop.eup %2423 }
 0x354   : > { %v1299_v20 = vadd.f32 1.0, %v2424_v15  ;;  %v2426_v21 = vpop.eup %2425 }
 0x355   : > { %v1300_v22 = vadd.f32 1.0, %v2426_v21  ;;  %v2428_v23 = vpop.eup %2427 }
 0x356   : > { %2431 = vrcp.f32 %v1299_v20  ;;  %v2430_v50 = vpop.eup %2429  ;;  %v1317_v20 = vld [vmem:[%s3157_s6 + $0x58] sm:$0xff] }
 0x357   : > { %2433 = vrcp.f32 %v1300_v22  ;;  %v1301_v58 = vadd.f32 1.0, %v2430_v50 }
 0x359   : > { %2435 = vrcp.f32 %v1301_v58 }
 0x360   : > { %v2432_v53 = vpop.eup %2431 }
 0x361   : > { %v1310_v56 = vmul.f32 %v2432_v53, %v2428_v23  ;;  %v2434_v57 = vpop.eup %2433 }
 0x362   : > { %v1309_v59 = vmul.f32 %v2434_v57, %v3163_v55  ;;  %v1314_v55 = vld [vmem:[%s3157_s6 + $0x40] sm:$0xff] }
 0x363   : > { %v2436_v61 = vpop.eup %2435 }
 0x364   : > { %v3205_v60 = vadd.f32 %v1310_v56, %v1309_v59 }
 0x366   : > { %2437 = vtanh.f32 %v3205_v60 }
 0x370   : > { %v2438_v62 = vpop.eup %2437 }
 0x371   : > { %v1313_v63 = vmul.f32 %v2438_v62, %v2436_v61 }
 0x373   : > { %v1318_v0 = vpack.c.bf16 %v1313_v63, %v1313_v63 }
 0x375   : > { %1352 = vmatmul.mubr.bf16.vlgmr.msra.gmra.mrb[8].mxu0 %v1318_v0  ;;  %1393 = vmatmul.mubr.bf16.vlgmr.msra.gmra.mrb[8].mxu1 %v1318_v0 }
 0x376   : > { %1435 = vmatpush1.bf16.msra.mxu0 %v2934_v17  ;;  %1476 = vmatpush1.bf16.msra.mxu1 %v2964_v27 }
 0x377   : > { %1436 = vmatprep.subr.bf16.mxu0 %v2942_v19  ;;  %1477 = vmatprep.subr.bf16.mxu1 %v2983_v30 }
 0x378   : > { %1466 = vmatprep.mubr.bf16.mxu0 %v2592_v18  ;;  %1507 = vmatprep.mubr.bf16.mxu1 %v2592_v18 }
 0x37a   : > { %1437 = vmatpush1.bf16.msra.mxu0 %v2948_v24  ;;  %1478 = vmatpush1.bf16.msra.mxu1 %v2988_v31 }
 0x37b   : > { %1438 = vmatprep.subr.bf16.mxu0 %v2954_v25  ;;  %1479 = vmatprep.subr.bf16.mxu1 %v3005_v34 }
 0x37e   : > { %1439 = vmatpush1.bf16.msra.mxu0 %v2970_v28  ;;  %1480 = vmatpush1.bf16.msra.mxu1 %v3012_v35 }
 0x37f   : > { %1440 = vmatprep.subr.bf16.mxu0 %v2977_v29  ;;  %1481 = vmatprep.subr.bf16.mxu1 %v3018_v36 }
 0x382   : > { %1441 = vmatpush1.bf16.msra.mxu0 %v2995_v32  ;;  %1482 = vmatpush1.bf16.msra.mxu1 %v3036_v39 }
 0x383   : > { %1442 = vmatprep.subr.bf16.mxu0 %v3000_v33  ;;  %1483 = vmatprep.subr.bf16.mxu1 %v3042_v40 }
 0x386   : > { %1443 = vmatpush1.bf16.msra.mxu0 %v3024_v37  ;;  %1484 = vmatpush1.bf16.msra.mxu1 %v3060_v43 }
 0x387   : > { %1444 = vmatprep.subr.bf16.mxu0 %v3030_v38  ;;  %1485 = vmatprep.subr.bf16.mxu1 %v3066_v44 }
 0x38a   : > { %1445 = vmatpush1.bf16.msra.mxu0 %v3047_v41  ;;  %1486 = vmatpush1.bf16.msra.mxu1 %v3084_v47 }
 0x38b   : > { %1446 = vmatprep.subr.bf16.mxu0 %v3053_v42  ;;  %1487 = vmatprep.subr.bf16.mxu1 %v3090_v48 }
 0x38e   : > { %1447 = vmatpush1.bf16.msra.mxu0 %v3072_v45  ;;  %1488 = vmatpush1.bf16.msra.mxu1 %v3103_v51 }
 0x38f   : > { %1448 = vmatprep.subr.bf16.mxu0 %v3078_v46  ;;  %1489 = vmatprep.subr.bf16.mxu1 %v3109_v52 }
 0x392   : > { %1449 = vmatpush1.bf16.msra.mxu0 %v3096_v49  ;;  %1490 = vmatpush1.bf16.msra.mxu1 %v3116_v54 }
 0x393   : > { %1549 = vmatprep.subr.bf16.mxu0 %v2929_v16  ;;  %1590 = vmatprep.subr.bf16.mxu1 %v2959_v26 }
 0x448   : > { %v1353_v2 = vpop.f32.mrb[8].mxu0  ;;  %v1394_v3 = vpop.f32.mrb[8].mxu1 }
 0x449   : > { %v1401_v4 = vadd.f32 %v1353_v2, %v1314_v55  ;;  %v1355_v5 = vpop.f32.mrb[9].mxu0  ;;  %v1396_v6 = vpop.f32.mrb[9].mxu1  ;;  %v1403_v15 = vadd.f32 %v1394_v3, %v1316_v14 }
 0x44a   : > { %v1402_v7 = vadd.f32 %v1355_v5, %v1315_v1  ;;  %v1357_v8 = vpop.f32.mrb[10].mxu0  ;;  %v1398_v9 = vpop.f32.mrb[10].mxu1  ;;  %v1404_v21 = vadd.f32 %v1396_v6, %v1317_v20  ;;  %v1430_v5 = vld [vmem:[%s3157_s6 + $0x68] sm:$0xff] }
 0x44b   : > { %v2200_v10 = vmul.f32 -1.442695, %v1401_v4  ;;  %v1358_v11 = vpop.f32.mrb[11].mxu0  ;;  %v1399_v12 = vpop.f32.mrb[11].mxu1  ;;  %v2202_v22 = vmul.f32 -1.442695, %v1403_v15 }
 0x44c   : > { %v2201_v13 = vmul.f32 -1.442695, %v1402_v7 }
 0x44d   : > { %2439 = vpow2.f32 %v2200_v10 }
 0x44e   : > { %2441 = vpow2.f32 %v2201_v13 }
 0x44f   : > { %2443 = vtanh.f32 %v1404_v21 }
 0x450   : > { %2445 = vpow2.f32 %v2202_v22  ;;  %v1431_v22 = vld [vmem:[%s3157_s6 + $0x70] sm:$0xff] }
 0x457   : > { %v2440_v23 = vpop.eup %2439 }
 0x458   : > { %v1414_v50 = vadd.f32 1.0, %v2440_v23  ;;  %v2442_v53 = vpop.eup %2441 }
 0x459   : > { %v1415_v56 = vadd.f32 1.0, %v2442_v53  ;;  %v2444_v57 = vpop.eup %2443 }
 0x45a   : > { %2447 = vrcp.f32 %v1414_v50  ;;  %v2446_v58 = vpop.eup %2445  ;;  %v1432_v50 = vld [vmem:[%s3157_s6 + $0x78] sm:$0xff] }
 0x45b   : > { %2449 = vrcp.f32 %v1415_v56  ;;  %v1416_v63 = vadd.f32 1.0, %v2446_v58 }
 0x45d   : > { %2451 = vrcp.f32 %v1416_v63 }
 0x464   : > { %v2448_v59 = vpop.eup %2447 }
 0x465   : > { %v1425_v61 = vmul.f32 %v2448_v59, %v2444_v57  ;;  %v2450_v62 = vpop.eup %2449 }
 0x466   : > { %v1424_v0 = vmul.f32 %v2450_v62, %v3205_v60  ;;  %v1429_v60 = vld [vmem:[%s3157_s6 + $0x60] sm:$0xff] }
 0x467   : > { %v2452_v1 = vpop.eup %2451 }
 0x468   : > { %v3247_v55 = vadd.f32 %v1425_v61, %v1424_v0 }
 0x46a   : > { %2453 = vtanh.f32 %v3247_v55 }
 0x474   : > { %v2454_v2 = vpop.eup %2453 }
 0x475   : > { %v1428_v3 = vmul.f32 %v2454_v2, %v2452_v1 }
 0x477   : > { %v1433_v4 = vpack.c.bf16 %v1428_v3, %v1428_v3 }
 0x479   : > { %1467 = vmatmul.mubr.bf16.vlgmr.msra.gmra.mrb[12].mxu0 %v1433_v4  ;;  %1508 = vmatmul.mubr.bf16.vlgmr.msra.gmra.mrb[12].mxu1 %v1433_v4 }
 0x47a   : > { %1550 = vmatpush1.bf16.msra.mxu0 %v2934_v17  ;;  %1591 = vmatpush1.bf16.msra.mxu1 %v2964_v27 }
 0x47b   : > { %1551 = vmatprep.subr.bf16.mxu0 %v2942_v19  ;;  %1592 = vmatprep.subr.bf16.mxu1 %v2983_v30 }
 0x47c   : > { %1581 = vmatprep.mubr.bf16.mxu0 %v2592_v18  ;;  %1622 = vmatprep.mubr.bf16.mxu1 %v2592_v18 }
 0x47e   : > { %1552 = vmatpush1.bf16.msra.mxu0 %v2948_v24  ;;  %1593 = vmatpush1.bf16.msra.mxu1 %v2988_v31 }
 0x47f   : > { %1553 = vmatprep.subr.bf16.mxu0 %v2954_v25  ;;  %1594 = vmatprep.subr.bf16.mxu1 %v3005_v34 }
 0x482   : > { %1554 = vmatpush1.bf16.msra.mxu0 %v2970_v28  ;;  %1595 = vmatpush1.bf16.msra.mxu1 %v3012_v35 }
 0x483   : > { %1555 = vmatprep.subr.bf16.mxu0 %v2977_v29  ;;  %1596 = vmatprep.subr.bf16.mxu1 %v3018_v36 }
 0x486   : > { %1556 = vmatpush1.bf16.msra.mxu0 %v2995_v32  ;;  %1597 = vmatpush1.bf16.msra.mxu1 %v3036_v39 }
 0x487   : > { %1557 = vmatprep.subr.bf16.mxu0 %v3000_v33  ;;  %1598 = vmatprep.subr.bf16.mxu1 %v3042_v40 }
 0x48a   : > { %1558 = vmatpush1.bf16.msra.mxu0 %v3024_v37  ;;  %1599 = vmatpush1.bf16.msra.mxu1 %v3060_v43 }
 0x48b   : > { %1559 = vmatprep.subr.bf16.mxu0 %v3030_v38  ;;  %1600 = vmatprep.subr.bf16.mxu1 %v3066_v44 }
 0x48e   : > { %1560 = vmatpush1.bf16.msra.mxu0 %v3047_v41  ;;  %1601 = vmatpush1.bf16.msra.mxu1 %v3084_v47 }
 0x48f   : > { %1561 = vmatprep.subr.bf16.mxu0 %v3053_v42  ;;  %1602 = vmatprep.subr.bf16.mxu1 %v3090_v48 }
 0x492   : > { %1562 = vmatpush1.bf16.msra.mxu0 %v3072_v45  ;;  %1603 = vmatpush1.bf16.msra.mxu1 %v3103_v51 }
 0x493   : > { %1563 = vmatprep.subr.bf16.mxu0 %v3078_v46  ;;  %1604 = vmatprep.subr.bf16.mxu1 %v3109_v52 }
 0x496   : > { %1564 = vmatpush1.bf16.msra.mxu0 %v3096_v49  ;;  %1605 = vmatpush1.bf16.msra.mxu1 %v3116_v54 }
 0x497   : > { %1664 = vmatprep.subr.bf16.mxu0 %v2929_v16  ;;  %1705 = vmatprep.subr.bf16.mxu1 %v2959_v26 }
 0x54c   : > { %v1468_v6 = vpop.f32.mrb[12].mxu0  ;;  %v1509_v7 = vpop.f32.mrb[12].mxu1 }
 0x54d   : > { %v1516_v8 = vadd.f32 %v1468_v6, %v1429_v60  ;;  %v1470_v9 = vpop.f32.mrb[13].mxu0  ;;  %v1511_v10 = vpop.f32.mrb[13].mxu1  ;;  %v1518_v23 = vadd.f32 %v1509_v7, %v1431_v22 }
 0x54e   : > { %v1517_v11 = vadd.f32 %v1470_v9, %v1430_v5  ;;  %v1472_v12 = vpop.f32.mrb[14].mxu0  ;;  %v1513_v13 = vpop.f32.mrb[14].mxu1  ;;  %v1519_v53 = vadd.f32 %v1511_v10, %v1432_v50  ;;  %v1545_v9 = vld [vmem:[%s3157_s6 + $0x88] sm:$0xff] }
 0x54f   : > { %v2203_v14 = vmul.f32 -1.442695, %v1516_v8  ;;  %v1473_v15 = vpop.f32.mrb[15].mxu0  ;;  %v1514_v20 = vpop.f32.mrb[15].mxu1  ;;  %v2205_v56 = vmul.f32 -1.442695, %v1518_v23 }
 0x550   : > { %v2204_v21 = vmul.f32 -1.442695, %v1517_v11 }
 0x551   : > { %2455 = vpow2.f32 %v2203_v14 }
 0x552   : > { %2457 = vpow2.f32 %v2204_v21 }
 0x553   : > { %2459 = vtanh.f32 %v1519_v53 }
 0x554   : > { %2461 = vpow2.f32 %v2205_v56  ;;  %v1547_v56 = vld [vmem:[%s3157_s6 + $0x98] sm:$0xff] }
 0x55b   : > { %v2456_v57 = vpop.eup %2455 }
 0x55c   : > { %v1529_v58 = vadd.f32 1.0, %v2456_v57  ;;  %v2458_v59 = vpop.eup %2457 }
 0x55d   : > { %v1530_v61 = vadd.f32 1.0, %v2458_v59  ;;  %v2460_v62 = vpop.eup %2459 }
 0x55e   : > { %2463 = vrcp.f32 %v1529_v58  ;;  %v2462_v63 = vpop.eup %2461 }
 0x55f   : > { %2465 = vrcp.f32 %v1530_v61  ;;  %v1531_v3 = vadd.f32 1.0, %v2462_v63 }
 0x561   : > { %2467 = vrcp.f32 %v1531_v3 }
 0x568   : > { %v2464_v0 = vpop.eup %2463 }
 0x569   : > { %v1540_v1 = vmul.f32 %v2464_v0, %v2460_v62  ;;  %v2466_v2 = vpop.eup %2465 }
 0x56a   : > { %v1539_v4 = vmul.f32 %v2466_v2, %v3247_v55  ;;  %v1544_v55 = vld [vmem:[%s3157_s6 + $0x80] sm:$0xff] }
 0x56b   : > { %v2468_v5 = vpop.eup %2467 }
 0x56c   : > { %v3289_v60 = vadd.f32 %v1540_v1, %v1539_v4 }
 0x56e   : > { %2469 = vtanh.f32 %v3289_v60 }
 0x578   : > { %v2470_v6 = vpop.eup %2469 }
 0x579   : > { %v1543_v7 = vmul.f32 %v2470_v6, %v2468_v5 }
 0x57b   : > { %v1548_v8 = vpack.c.bf16 %v1543_v7, %v1543_v7 }
 0x57d   : > { %1582 = vmatmul.mubr.bf16.vlgmr.msra.gmra.mrb[16].mxu0 %v1548_v8  ;;  %1623 = vmatmul.mubr.bf16.vlgmr.msra.gmra.mrb[16].mxu1 %v1548_v8 }
 0x57e   : > { %1665 = vmatpush1.bf16.msra.mxu0 %v2934_v17  ;;  %1706 = vmatpush1.bf16.msra.mxu1 %v2964_v27 }
 0x57f   : > { %1666 = vmatprep.subr.bf16.mxu0 %v2942_v19  ;;  %1707 = vmatprep.subr.bf16.mxu1 %v2983_v30 }
 0x580   : > { %1696 = vmatprep.mubr.bf16.mxu0 %v2592_v18  ;;  %1737 = vmatprep.mubr.bf16.mxu1 %v2592_v18 }
 0x582   : > { %1667 = vmatpush1.bf16.msra.mxu0 %v2948_v24  ;;  %1708 = vmatpush1.bf16.msra.mxu1 %v2988_v31 }
 0x583   : > { %1668 = vmatprep.subr.bf16.mxu0 %v2954_v25  ;;  %1709 = vmatprep.subr.bf16.mxu1 %v3005_v34 }
 0x586   : > { %1669 = vmatpush1.bf16.msra.mxu0 %v2970_v28  ;;  %1710 = vmatpush1.bf16.msra.mxu1 %v3012_v35 }
 0x587   : > { %1670 = vmatprep.subr.bf16.mxu0 %v2977_v29  ;;  %1711 = vmatprep.subr.bf16.mxu1 %v3018_v36 }
 0x58a   : > { %1671 = vmatpush1.bf16.msra.mxu0 %v2995_v32  ;;  %1712 = vmatpush1.bf16.msra.mxu1 %v3036_v39 }
 0x58b   : > { %1672 = vmatprep.subr.bf16.mxu0 %v3000_v33  ;;  %1713 = vmatprep.subr.bf16.mxu1 %v3042_v40 }
 0x58e   : > { %1673 = vmatpush1.bf16.msra.mxu0 %v3024_v37  ;;  %1714 = vmatpush1.bf16.msra.mxu1 %v3060_v43 }
 0x58f   : > { %1674 = vmatprep.subr.bf16.mxu0 %v3030_v38  ;;  %1715 = vmatprep.subr.bf16.mxu1 %v3066_v44 }
 0x592   : > { %1675 = vmatpush1.bf16.msra.mxu0 %v3047_v41  ;;  %1716 = vmatpush1.bf16.msra.mxu1 %v3084_v47 }
 0x593   : > { %1676 = vmatprep.subr.bf16.mxu0 %v3053_v42  ;;  %1717 = vmatprep.subr.bf16.mxu1 %v3090_v48 }
 0x596   : > { %1677 = vmatpush1.bf16.msra.mxu0 %v3072_v45  ;;  %1718 = vmatpush1.bf16.msra.mxu1 %v3103_v51 }
 0x597   : > { %1678 = vmatprep.subr.bf16.mxu0 %v3078_v46  ;;  %1719 = vmatprep.subr.bf16.mxu1 %v3109_v52 }
 0x59a   : > { %1679 = vmatpush1.bf16.msra.mxu0 %v3096_v49  ;;  %1720 = vmatpush1.bf16.msra.mxu1 %v3116_v54 }
 0x59b   : > { %1779 = vmatprep.subr.bf16.mxu0 %v2929_v16  ;;  %1820 = vmatprep.subr.bf16.mxu1 %v2959_v26  ;;  %v1546_v16 = vld [vmem:[%s3157_s6 + $0x90] sm:$0xff] }
 0x650   : > { %v1583_v10 = vpop.f32.mrb[16].mxu0  ;;  %v1624_v11 = vpop.f32.mrb[16].mxu1 }
 0x651   : > { %v1631_v12 = vadd.f32 %v1583_v10, %v1544_v55  ;;  %v1585_v13 = vpop.f32.mrb[17].mxu0  ;;  %v1626_v14 = vpop.f32.mrb[17].mxu1  ;;  %v1633_v26 = vadd.f32 %v1624_v11, %v1546_v16  ;;  %v2542_v16 = vld [vmem:[%s3496_s2 + $0x28] ss:$16 sps:$4 sm:$0xff]  }
 0x652   : > { %v1632_v15 = vadd.f32 %v1585_v13, %v1545_v9  ;;  %v1587_v20 = vpop.f32.mrb[18].mxu0  ;;  %v1628_v21 = vpop.f32.mrb[18].mxu1  ;;  %v1634_v57 = vadd.f32 %v1626_v14, %v1547_v56  ;;  %v2544_v56 = vld [vmem:[%s3496_s2 + $0x4c] ss:$16 sps:$4 sm:$0xff]  }
 0x653   : > { %v2206_v22 = vmul.f32 -1.442695, %v1631_v12  ;;  %v1588_v23 = vpop.f32.mrb[19].mxu0  ;;  %v1629_v50 = vpop.f32.mrb[19].mxu1  ;;  %v2208_v58 = vmul.f32 -1.442695, %v1633_v26 }
 0x654   : > { %v2207_v53 = vmul.f32 -1.442695, %v1632_v15  ;;  %v2537_v21 = vld [vmem:[%s3496_s2] ss:$16 sps:$4 sm:$0xff]   ;;  %v2539_v23 = vld [vmem:[%s3496_s2 + $0x24] ss:$16 sps:$4 sm:$0xff]  }
 0x655   : > { %2471 = vpow2.f32 %v2206_v22  ;;  %v2538_v22 = vld [vmem:[%s3496_s2 + $0x8] ss:$16 sps:$4 sm:$0xff]   ;;  %v2540_v50 = vld [vmem:[%s3496_s2 + $0x2c] ss:$16 sps:$4 sm:$0xff]   ;;  %v2543_v26 = vld [vmem:[%s3496_s2 + $0x44] ss:$16 sps:$4 sm:$0xff]  }
 0x656   : > { %2473 = vpow2.f32 %v2207_v53  ;;  %v2541_v53 = vld [vmem:[%s3496_s2 + $0x20] ss:$16 sps:$4 sm:$0xff]  }
 0x657   : > { %2475 = vtanh.f32 %v1634_v57  ;;  %v2546_v57 = vld [vmem:[%s3496_s2 + $0x48] ss:$16 sps:$4 sm:$0xff]  }
 0x658   : > { %2477 = vpow2.f32 %v2208_v58  ;;  %v2547_v58 = vld [vmem:[%s3496_s2 + $0x64] ss:$16 sps:$4 sm:$0xff]  }
 0x65f   : > { %v2472_v59 = vpop.eup %2471 }
 0x660   : > { %v1644_v61 = vadd.f32 1.0, %v2472_v59  ;;  %v2474_v62 = vpop.eup %2473  ;;  %v2548_v59 = vld [vmem:[%s3496_s2 + $0x6c] ss:$16 sps:$4 sm:$0xff]  }
 0x661   : > { %v1645_v63 = vadd.f32 1.0, %v2474_v62  ;;  %v2476_v0 = vpop.eup %2475  ;;  %v2550_v62 = vld [vmem:[%s3496_s2 + $0x68] ss:$16 sps:$4 sm:$0xff]  }
 0x662   : > { %2479 = vrcp.f32 %v1644_v61  ;;  %v2478_v1 = vpop.eup %2477  ;;  %v2549_v61 = vld [vmem:[%s3496_s2 + $0x60] ss:$16 sps:$4 sm:$0xff]  }
 0x663   : > { %2481 = vrcp.f32 %v1645_v63  ;;  %v1646_v5 = vadd.f32 1.0, %v2478_v1  ;;  %v2551_v63 = vld [vmem:[%s3496_s2 + $0x84] ss:$16 sps:$4 sm:$0xff]   ;;  %v2553_v1 = vld [vmem:[%s3496_s2 + $0x80] ss:$16 sps:$4 sm:$0xff]  }
 0x665   : > { %2483 = vrcp.f32 %v1646_v5  ;;  %v2557_v5 = vld [vmem:[%s3496_s2 + $0xa0] ss:$16 sps:$4 sm:$0xff]  }
 0x66c   : > { %v2480_v2 = vpop.eup %2479 }
 0x66d   : > { %v1655_v3 = vmul.f32 %v2480_v2, %v2476_v0  ;;  %v2482_v4 = vpop.eup %2481  ;;  %v2552_v0 = vld [vmem:[%s3496_s2 + $0x8c] ss:$16 sps:$4 sm:$0xff]   ;;  %v2554_v2 = vld [vmem:[%s3496_s2 + $0x88] ss:$16 sps:$4 sm:$0xff]  }
 0x66e   : > { %v1654_v6 = vmul.f32 %v2482_v4, %v3289_v60  ;;  %v2556_v4 = vld [vmem:[%s3496_s2 + $0xac] ss:$16 sps:$4 sm:$0xff]  }
 0x66f   : > { %v2484_v8 = vpop.eup %2483 }
 0x670   : > { %v3331_v7 = vadd.f32 %v1655_v3, %v1654_v6  ;;  %v2555_v3 = vld [vmem:[%s3496_s2 + $0xa4] ss:$16 sps:$4 sm:$0xff]   ;;  %v2558_v6 = vld [vmem:[%s3496_s2 + $0xa8] ss:$16 sps:$4 sm:$0xff]  }
 0x672   : > { %2485 = vtanh.f32 %v3331_v7 }
 0x67c   : > { %v2486_v55 = vpop.eup %2485 }
 0x67d   : > { %v1658_v9 = vmul.f32 %v2486_v55, %v2484_v8  ;;  %v2560_v8 = vld [vmem:[%s3496_s2 + $0xcc] ss:$16 sps:$4 sm:$0xff]   ;;  %v2561_v55 = vld [vmem:[%s3496_s2 + $0xc0] ss:$16 sps:$4 sm:$0xff]  }
 0x67f   : > { %v1663_v10 = vpack.c.bf16 %v1658_v9, %v1658_v9  ;;  %v2562_v9 = vld [vmem:[%s3496_s2 + $0xc8] ss:$16 sps:$4 sm:$0xff]  }
 0x681   : > { %1697 = vmatmul.mubr.bf16.vlgmr.msra.gmra.mrb[20].mxu0 %v1663_v10  ;;  %1738 = vmatmul.mubr.bf16.vlgmr.msra.gmra.mrb[20].mxu1 %v1663_v10  ;;  %v2563_v10 = vld [vmem:[%s3496_s2 + $0xe4] ss:$16 sps:$4 sm:$0xff]  }
 0x682   : > { %1780 = vmatpush1.bf16.msra.mxu0 %v2934_v17  ;;  %1821 = vmatpush1.bf16.msra.mxu1 %v2964_v27  ;;  %v2535_v17 = vld [vmem:[%s3496_s2 + $0x4] ss:$16 sps:$4 sm:$0xff]  }
 0x683   : > { %1781 = vmatprep.subr.bf16.mxu0 %v2942_v19  ;;  %1822 = vmatprep.subr.bf16.mxu1 %v2983_v30  ;;  %v2536_v19 = vld [vmem:[%s3496_s2 + $0xc] ss:$16 sps:$4 sm:$0xff]  }
 0x684   : > { %1811 = vmatprep.mubr.bf16.mxu0 %v2592_v18  ;;  %1852 = vmatprep.mubr.bf16.mxu1 %v2592_v18 }
 0x686   : > { %1782 = vmatpush1.bf16.msra.mxu0 %v2948_v24  ;;  %1823 = vmatpush1.bf16.msra.mxu1 %v2988_v31  ;;  %v1659_v24 = vld [vmem:[%s3157_s6 + $0xa0] sm:$0xff] }
 0x687   : > { %1783 = vmatprep.subr.bf16.mxu0 %v2954_v25  ;;  %1824 = vmatprep.subr.bf16.mxu1 %v3005_v34  ;;  %v1660_v25 = vld [vmem:[%s3157_s6 + $0xa8] sm:$0xff] }
 0x68a   : > { %1784 = vmatpush1.bf16.msra.mxu0 %v2970_v28  ;;  %1825 = vmatpush1.bf16.msra.mxu1 %v3012_v35 }
 0x68b   : > { %1785 = vmatprep.subr.bf16.mxu0 %v2977_v29  ;;  %1826 = vmatprep.subr.bf16.mxu1 %v3018_v36 }
 0x68e   : > { %1786 = vmatpush1.bf16.msra.mxu0 %v2995_v32  ;;  %1827 = vmatpush1.bf16.msra.mxu1 %v3036_v39  ;;  %v1661_v39 = vld [vmem:[%s3157_s6 + $0xb0] sm:$0xff] }
 0x68f   : > { %1787 = vmatprep.subr.bf16.mxu0 %v3000_v33  ;;  %1828 = vmatprep.subr.bf16.mxu1 %v3042_v40 }
 0x692   : > { %1788 = vmatpush1.bf16.msra.mxu0 %v3024_v37  ;;  %1829 = vmatpush1.bf16.msra.mxu1 %v3060_v43 }
 0x693   : > { %1789 = vmatprep.subr.bf16.mxu0 %v3030_v38  ;;  %1830 = vmatprep.subr.bf16.mxu1 %v3066_v44 }
 0x696   : > { %1790 = vmatpush1.bf16.msra.mxu0 %v3047_v41  ;;  %1831 = vmatpush1.bf16.msra.mxu1 %v3084_v47  ;;  %v1662_v41 = vld [vmem:[%s3157_s6 + $0xb8] sm:$0xff] }
 0x697   : > { %1791 = vmatprep.subr.bf16.mxu0 %v3053_v42  ;;  %1832 = vmatprep.subr.bf16.mxu1 %v3090_v48 }
 0x69a   : > { %1792 = vmatpush1.bf16.msra.mxu0 %v3072_v45  ;;  %1833 = vmatpush1.bf16.msra.mxu1 %v3103_v51 }
 0x69b   : > { %1793 = vmatprep.subr.bf16.mxu0 %v3078_v46  ;;  %1834 = vmatprep.subr.bf16.mxu1 %v3109_v52 }
 0x69e   : > { %1794 = vmatpush1.bf16.msra.mxu0 %v3096_v49  ;;  %1835 = vmatpush1.bf16.msra.mxu1 %v3116_v54 }
 0x69f   : > { %1894 = vmatprep.subr.bf16.mxu0 %v2535_v17  ;;  %1935 = vmatprep.subr.bf16.mxu1 %v2536_v19  ;;  %v2564_v17 = vld [vmem:[%s3496_s2 + $0xec] ss:$16 sps:$4 sm:$0xff]   ;;  %v2565_v19 = vld [vmem:[%s3496_s2 + $0xe0] ss:$16 sps:$4 sm:$0xff]  }
 0x754   : > { %v1698_v27 = vpop.f32.mrb[20].mxu0  ;;  %v1739_v28 = vpop.f32.mrb[20].mxu1 }
 0x755   : > { %v1746_v29 = vadd.f32 %v1698_v27, %v1659_v24  ;;  %v1700_v30 = vpop.f32.mrb[21].mxu0  ;;  %v1741_v31 = vpop.f32.mrb[21].mxu1  ;;  %v1748_v40 = vadd.f32 %v1739_v28, %v1661_v39  ;;  %v2566_v24 = vld [vmem:[%s3496_s2 + $0xe8] ss:$16 sps:$4 sm:$0xff]  }
 0x756   : > { %v1747_v32 = vadd.f32 %v1700_v30, %v1660_v25  ;;  %v1702_v33 = vpop.f32.mrb[22].mxu0  ;;  %v1743_v34 = vpop.f32.mrb[22].mxu1  ;;  %v1749_v42 = vadd.f32 %v1741_v31, %v1662_v41  ;;  %v1774_v25 = vld [vmem:[%s3157_s6 + $0xc0] sm:$0xff]  ;;  %v1775_v27 = vld [vmem:[%s3157_s6 + $0xc8] sm:$0xff] }
 0x757   : > { %v2209_v35 = vmul.f32 -1.442695, %v1746_v29  ;;  %v1703_v36 = vpop.f32.mrb[23].mxu0  ;;  %v1744_v37 = vpop.f32.mrb[23].mxu1  ;;  %v2211_v43 = vmul.f32 -1.442695, %v1748_v40 }
 0x758   : > { %v2210_v38 = vmul.f32 -1.442695, %v1747_v32  ;;  %v1776_v40 = vld [vmem:[%s3157_s6 + $0xd0] sm:$0xff] }
 0x759   : > { %2487 = vpow2.f32 %v2209_v35 }
 0x75a   : > { %2489 = vpow2.f32 %v2210_v38 }
 0x75b   : > { %2491 = vtanh.f32 %v1749_v42  ;;  %v1777_v42 = vld [vmem:[%s3157_s6 + $0xd8] sm:$0xff] }
 0x75c   : > { %2493 = vpow2.f32 %v2211_v43 }
 0x763   : > { %v2488_v44 = vpop.eup %2487 }
 0x764   : > { %v1759_v45 = vadd.f32 1.0, %v2488_v44  ;;  %v2490_v46 = vpop.eup %2489 }
 0x765   : > { %v1760_v47 = vadd.f32 1.0, %v2490_v46  ;;  %v2492_v48 = vpop.eup %2491 }
 0x766   : > { %2495 = vrcp.f32 %v1759_v45  ;;  %v2494_v49 = vpop.eup %2493 }
 0x767   : > { %2497 = vrcp.f32 %v1760_v47  ;;  %v1761_v60 = vadd.f32 1.0, %v2494_v49 }
 0x769   : > { %2499 = vrcp.f32 %v1761_v60 }
 0x770   : > { %v2496_v51 = vpop.eup %2495 }
 0x771   : > { %v1770_v52 = vmul.f32 %v2496_v51, %v2492_v48  ;;  %v2498_v54 = vpop.eup %2497 }
 0x772   : > { %v1769_v11 = vmul.f32 %v2498_v54, %v3331_v7  ;;  %v2559_v7 = vld [vmem:[%s3496_s2 + $0xc4] ss:$16 sps:$4 sm:$0xff]  }
 0x773   : > { %v2500_v13 = vpop.eup %2499 }
 0x774   : > { %v3377_v12 = vadd.f32 %v1770_v52, %v1769_v11 }
 0x776   : > { %2501 = vtanh.f32 %v3377_v12 }
 0x780   : > { %v2502_v14 = vpop.eup %2501 }
 0x781   : > { %v1773_v15 = vmul.f32 %v2502_v14, %v2500_v13 }
 0x783   : > { %v1778_v20 = vpack.c.bf16 %v1773_v15, %v1773_v15 }
 0x785   : > { %1812 = vmatmul.mubr.bf16.vlgmr.msra.gmra.mrb[24].mxu0 %v1778_v20  ;;  %1853 = vmatmul.mubr.bf16.vlgmr.msra.gmra.mrb[24].mxu1 %v1778_v20 }
 0x786   : > { %1895 = vmatpush1.bf16.msra.mxu0 %v2537_v21  ;;  %1936 = vmatpush1.bf16.msra.mxu1 %v2538_v22 }
 0x787   : > { %1896 = vmatprep.subr.bf16.mxu0 %v2539_v23  ;;  %1937 = vmatprep.subr.bf16.mxu1 %v2540_v50  ;;  %v1889_v23 = vld [vmem:[%s3157_s6 + $0xe0] sm:$0xff]  ;;  %v1890_v50 = vld [vmem:[%s3157_s6 + $0xe8] sm:$0xff] }
 0x788   : > { %1926 = vmatprep.mubr.bf16.mxu0 %v2592_v18  ;;  %1967 = vmatprep.mubr.bf16.mxu1 %v2592_v18  ;;  %v2545_v18 = vld [vmem:[%s3496_s2 + $0x40] ss:$16 sps:$4 sm:$0xff]  }
 0x78a   : > { %1897 = vmatpush1.bf16.msra.mxu0 %v2541_v53  ;;  %1938 = vmatpush1.bf16.msra.mxu1 %v2542_v16 }
 0x78b   : > { %1898 = vmatprep.subr.bf16.mxu0 %v2543_v26  ;;  %1939 = vmatprep.subr.bf16.mxu1 %v2544_v56 }
 0x78e   : > { %1899 = vmatpush1.bf16.msra.mxu0 %v2545_v18  ;;  %1940 = vmatpush1.bf16.msra.mxu1 %v2546_v57 }
 0x78f   : > { %1900 = vmatprep.subr.bf16.mxu0 %v2547_v58  ;;  %1941 = vmatprep.subr.bf16.mxu1 %v2548_v59 }
 0x792   : > { %1901 = vmatpush1.bf16.msra.mxu0 %v2549_v61  ;;  %1942 = vmatpush1.bf16.msra.mxu1 %v2550_v62 }
 0x793   : > { %1902 = vmatprep.subr.bf16.mxu0 %v2551_v63  ;;  %1943 = vmatprep.subr.bf16.mxu1 %v2552_v0  ;;  %v1891_v0 = vld [vmem:[%s3157_s6 + $0xf0] sm:$0xff] }
 0x796   : > { %1903 = vmatpush1.bf16.msra.mxu0 %v2553_v1  ;;  %1944 = vmatpush1.bf16.msra.mxu1 %v2554_v2  ;;  %v1892_v2 = vld [vmem:[%s3157_s6 + $0xf8] sm:$0xff] }
 0x797   : > { %1904 = vmatprep.subr.bf16.mxu0 %v2555_v3  ;;  %1945 = vmatprep.subr.bf16.mxu1 %v2556_v4 }
 0x79a   : > { %1905 = vmatpush1.bf16.msra.mxu0 %v2557_v5  ;;  %1946 = vmatpush1.bf16.msra.mxu1 %v2558_v6 }
 0x79b   : > { %1906 = vmatprep.subr.bf16.mxu0 %v2559_v7  ;;  %1947 = vmatprep.subr.bf16.mxu1 %v2560_v8 }
 0x79e   : > { %1907 = vmatpush1.bf16.msra.mxu0 %v2561_v55  ;;  %1948 = vmatpush1.bf16.msra.mxu1 %v2562_v9 }
 0x79f   : > { %1908 = vmatprep.subr.bf16.mxu0 %v2563_v10  ;;  %1949 = vmatprep.subr.bf16.mxu1 %v2564_v17 }
 0x7a2   : > { %1909 = vmatpush1.bf16.msra.mxu0 %v2565_v19  ;;  %1950 = vmatpush1.bf16.msra.mxu1 %v2566_v24 }
 0x858   : > { %v1813_v28 = vpop.f32.mrb[24].mxu0  ;;  %v1854_v29 = vpop.f32.mrb[24].mxu1 }
 0x859   : > { %v1861_v30 = vadd.f32 %v1813_v28, %v1774_v25  ;;  %v1815_v31 = vpop.f32.mrb[25].mxu0  ;;  %v1856_v32 = vpop.f32.mrb[25].mxu1  ;;  %v1863_v41 = vadd.f32 %v1854_v29, %v1776_v40 }
 0x85a   : > { %v1862_v33 = vadd.f32 %v1815_v31, %v1775_v27  ;;  %v1817_v34 = vpop.f32.mrb[26].mxu0  ;;  %v1858_v35 = vpop.f32.mrb[26].mxu1  ;;  %v1864_v43 = vadd.f32 %v1856_v32, %v1777_v42 }
 0x85b   : > { %v2212_v36 = vmul.f32 -1.442695, %v1861_v30  ;;  %v1818_v37 = vpop.f32.mrb[27].mxu0  ;;  %v1859_v38 = vpop.f32.mrb[27].mxu1  ;;  %v2214_v44 = vmul.f32 -1.442695, %v1863_v41 }
 0x85c   : > { %v2213_v39 = vmul.f32 -1.442695, %v1862_v33 }
 0x85d   : > { %2503 = vpow2.f32 %v2212_v36 }
 0x85e   : > { %2505 = vpow2.f32 %v2213_v39 }
 0x85f   : > { %2507 = vtanh.f32 %v1864_v43 }
 0x860   : > { %2509 = vpow2.f32 %v2214_v44 }
 0x867   : > { %v2504_v45 = vpop.eup %2503 }
 0x868   : > { %v1874_v46 = vadd.f32 1.0, %v2504_v45  ;;  %v2506_v47 = vpop.eup %2505 }
 0x869   : > { %v1875_v48 = vadd.f32 1.0, %v2506_v47  ;;  %v2508_v49 = vpop.eup %2507 }
 0x86a   : > { %2511 = vrcp.f32 %v1874_v46  ;;  %v2510_v51 = vpop.eup %2509 }
 0x86b   : > { %2513 = vrcp.f32 %v1875_v48  ;;  %v1876_v11 = vadd.f32 1.0, %v2510_v51 }
 0x86d   : > { %2515 = vrcp.f32 %v1876_v11 }
 0x874   : > { %v2512_v52 = vpop.eup %2511 }
 0x875   : > { %v1885_v54 = vmul.f32 %v2512_v52, %v2508_v49  ;;  %v2514_v60 = vpop.eup %2513 }
 0x876   : > { %v1884_v13 = vmul.f32 %v2514_v60, %v3377_v12 }
 0x877   : > { %v2516_v15 = vpop.eup %2515 }
 0x878   : > { %v1886_v14 = vadd.f32 %v1885_v54, %v1884_v13 }
 0x87a   : > { %2517 = vtanh.f32 %v1886_v14 }
 0x884   : > { %v2518_v20 = vpop.eup %2517 }
 0x885   : > { %v1888_v21 = vmul.f32 %v2518_v20, %v2516_v15 }
 0x887   : > { %v1893_v22 = vpack.c.bf16 %v1888_v21, %v1888_v21 }
 0x889   : > { %1927 = vmatmul.mubr.bf16.vlgmr.msra.gmra.mrb[28].mxu0 %v1893_v22  ;;  %1968 = vmatmul.mubr.bf16.vlgmr.msra.gmra.mrb[28].mxu1 %v1893_v22 }
 0x95c   : > { %v1928_v53 = vpop.f32.mrb[28].mxu0  ;;  %v1969_v16 = vpop.f32.mrb[28].mxu1 }
 0x95d   : > { %v1976_v26 = vadd.f32 %v1928_v53, %v1889_v23  ;;  %v1930_v56 = vpop.f32.mrb[29].mxu0  ;;  %v1971_v18 = vpop.f32.mrb[29].mxu1  ;;  %v1978_v1 = vadd.f32 %v1969_v16, %v1891_v0 }
 0x95e   : > { %v1977_v57 = vadd.f32 %v1930_v56, %v1890_v50  ;;  %v1932_v12 = vpop.f32.mrb[30].mxu0  ;;  %v1973_v58 = vpop.f32.mrb[30].mxu1  ;;  %v1979_v3 = vadd.f32 %v1971_v18, %v1892_v2 }
 0x95f   : > { %v2215_v59 = vmul.f32 -1.442695, %v1976_v26  ;;  %v1933_v61 = vpop.f32.mrb[31].mxu0  ;;  %v1974_v62 = vpop.f32.mrb[31].mxu1  ;;  %v2217_v4 = vmul.f32 -1.442695, %v1978_v1 }
 0x960   : > { %v2216_v63 = vmul.f32 -1.442695, %v1977_v57 }
 0x961   : > { %2519 = vpow2.f32 %v2215_v59 }
 0x962   : > { %2521 = vpow2.f32 %v2216_v63 }
 0x963   : > { %2523 = vtanh.f32 %v1979_v3 }
 0x964   : > { %2525 = vpow2.f32 %v2217_v4 }
 0x96b   : > { %v2520_v5 = vpop.eup %2519 }
 0x96c   : > { %v1989_v6 = vadd.f32 1.0, %v2520_v5  ;;  %v2522_v7 = vpop.eup %2521 }
 0x96d   : > { %v1990_v8 = vadd.f32 1.0, %v2522_v7  ;;  %v2524_v55 = vpop.eup %2523 }
 0x96e   : > { %2527 = vrcp.f32 %v1989_v6  ;;  %v2526_v9 = vpop.eup %2525 }
 0x96f   : > { %2529 = vrcp.f32 %v1990_v8  ;;  %v1991_v24 = vadd.f32 1.0, %v2526_v9 }
 0x971   : > { %2531 = vrcp.f32 %v1991_v24 }
 0x978   : > { %v2528_v10 = vpop.eup %2527 }
 0x979   : > { %v2000_v17 = vmul.f32 %v2528_v10, %v2524_v55  ;;  %v2530_v19 = vpop.eup %2529 }
 0x97a   : > { %v1999_v25 = vmul.f32 %v2530_v19, %v1886_v14 }
 0x97b   : > { %v2532_v28 = vpop.eup %2531 }
 0x97c   : > { %v2001_v27 = vadd.f32 %v2000_v17, %v1999_v25 }
 0x97e   : > { %2533 = vtanh.f32 %v2001_v27  ;;  %2005 = vst [vmem:[#allocation4] sm:$0xff] %v2001_v27 }
 0x988   : > { %v2534_v29 = vpop.eup %2533 }
 0x989   : > { %v2003_v30 = vmul.f32 %v2534_v29, %v2532_v28 }
 0x98b   : > { %2004 = vst [vmem:[#allocation3] sm:$0xff] %v2003_v30 }
 0x98c PF: > { %p2218_p9 = scmp.ne.s32.totalorder %s2581_s15, 1 }
 0x98e   : > { %2009 = sbr.rel (%p2218_p9) target bundleno = 2453 (0x995), region = 52 }
 0x992   : > { %v2010_v31 = vld [vmem:[#allocation3] sm:$0xff] (!%p2218_p9) }
 0x993   : > { %2011 = vst [vmem:[%s3498_s4] sm:$0xff] (!%p2218_p9), %v2010_v31 }
 0x995 PF: > { %s14_s17 = sadd.s32 1, %s2589_s17   ;;  %s3499_s15 = smov %s2585_s16 }
 0x996   : > { %p11_p10 = scmp.ge.s32.totalorder %s14_s17, 4   ;;  %s3500_s16 = smov %s3502_s18 }
 0x998   :  { %13 = sbr.rel (!%p11_p10) target bundleno = 2 (0x2), region = 84 }

</bundles_post_ra>
